<compile_context>
chip_gen: v7x
topology: tpu7x:2x2x1
jax: 0.10.0
libtpu: 0.0.40
codegen_flags: <defaults>
</compile_context>

<pallas_src>
import math

import jax
import jax.numpy as jnp
import numpy as np
from jax.experimental import pallas as pl
from jax.experimental.pallas import tpu as pltpu


def _egp_kernel(x_ref, mrow_ref, mcol_ref, cos_ref, sin_ref,
                wqk_ref, bqk_ref, wrc_ref, brc_ref,
                out_ref,
                q_sc, k_sc, brow_sc, bcolt_sc, bm_sc):
    r = pl.program_id(1)
    heads = out_ref.shape[1]
    tm = out_ref.shape[2]
    s_pad = out_ref.shape[3]

    # ---- per-batch precompute: runs once per batch element (row-tile 0),
    #      results persist in VMEM scratch across row tiles ("arbitrary" axis).
    @pl.when(r == 0)
    def _():
        x = x_ref[0]                                                   # (S_pad, H)
        cos = cos_ref[...]
        sin = sin_ref[...]
        q = jnp.dot(x, wqk_ref[0], preferred_element_type=jnp.float32) + bqk_ref[0]
        q2 = jnp.dot(x, wqk_ref[1], preferred_element_type=jnp.float32) + bqk_ref[1]
        k = jnp.dot(x, wqk_ref[2], preferred_element_type=jnp.float32) + bqk_ref[2]
        k2 = jnp.dot(x, wqk_ref[3], preferred_element_type=jnp.float32) + bqk_ref[3]
        q_sc[...] = q * cos + q2 * sin            # scale already folded into weights
        k_sc[...] = k * cos + k2 * sin
        brow_sc[...] = (jnp.dot(x, wrc_ref[0], preferred_element_type=jnp.float32)
                        + brc_ref[0])                                  # (S_pad, heads)
        bcolt_sc[...] = jnp.transpose(
            jnp.dot(x, wrc_ref[1], preferred_element_type=jnp.float32)
            + brc_ref[1])                                              # (heads, S_pad)

    # ---- per-row-tile, head-invariant part
    row0 = pl.multiple_of(r * tm, tm)
    q_tile = q_sc[pl.ds(row0, tm), :]                                  # (tm, D)
    base = jax.lax.dot_general(                                        # q_tile @ k.T
        q_tile, k_sc[...],
        dimension_numbers=(((1,), (1,)), ((), ())),
        preferred_element_type=jnp.float32)                            # (tm, S_pad)

    row_ids = row0 + jax.lax.broadcasted_iota(jnp.int32, (tm, s_pad), 0)
    col_ids = jax.lax.broadcasted_iota(jnp.int32, (tm, s_pad), 1)
    tril_pen = jnp.where(row_ids > col_ids, jnp.float32(1e12), jnp.float32(0.0))

    # single additive mask: padding (-inf rows/cols) + strict-lower-triangle penalty
    bm_sc[...] = base + mrow_ref[0] + mcol_ref[0] - tril_pen           # (tm, S_pad)

    # ---- per-head: two broadcast adds and one lane-dense (tm, S_pad) store
    for h in range(heads):
        brow_col = brow_sc[pl.ds(row0, tm), h:h + 1]                   # (tm, 1)
        bcol_row = bcolt_sc[h:h + 1, :]                                # (1, S_pad)
        out_ref[0, h] = bm_sc[...] + brow_col + bcol_row


def _rope_tables(seq_len, head_size):
    """cos/sin tables exactly as RoPEPositionEncoding builds them (sliced to seq_len)."""
    D = head_size
    pos = jnp.arange(seq_len, dtype=jnp.float32)[:, None]              # (S, 1)
    div = jnp.exp(jnp.arange(0, D, 2, dtype=jnp.float32)
                  * (-math.log(10000.0) / D))                          # (D/2,)
    ang = pos * div                                                    # (S, D/2)
    cos = jnp.repeat(jnp.cos(ang), 2, axis=-1)                         # (S, D)
    sin = jnp.repeat(jnp.sin(ang), 2, axis=-1)                         # (S, D)
    return cos.astype(jnp.float32), sin.astype(jnp.float32)


def _round_up(v, m):
    return (v + m - 1) // m * m


def efficient_global_pointer(inputs, mask, wp, bp, wq, bq, *, heads, head_size):
    """inputs: [B, S, H] f32, mask: [B, S] (1 = keep, 0 = pad). Returns [B, heads, S, S]."""
    B, S, H = inputs.shape
    D = head_size
    scale = 1.0 / math.sqrt(D)

    # Lane-dense output: pad sequence axis to a multiple of 128.
    S_pad = _round_up(max(S, 1), 128)
    tm = 256 if (S_pad % 256 == 0 and heads * 256 * S_pad * 4 <= (6 << 20)) else 128
    tm = min(tm, S_pad)
    n_tiles = S_pad // tm

    # ---- host-side constant folding --------------------------------------------
    # RoPE pair-rotation as a constant matrix: (v @ R)[2i] = -v[2i+1], (v @ R)[2i+1] = v[2i]
    idx = jnp.arange(0, D, 2)
    R = (jnp.zeros((D, D), jnp.float32)
         .at[idx + 1, idx].set(-1.0)
         .at[idx, idx + 1].set(1.0))

    wq_w = wp[:, :D] * scale            # 1/sqrt(D) folded into the q projection
    bq_v = bp[0, :D] * scale
    wq2_w = wq_w @ R
    bq2_v = bq_v @ R
    wk_w = wp[:, D:]
    bk_v = bp[0, D:]
    wk2_w = wk_w @ R
    bk2_v = bk_v @ R
    Wqk = jnp.stack([wq_w, wq2_w, wk_w, wk2_w], axis=0)                # (4, H, D)
    Bqk = jnp.stack([bq_v, bq2_v, bk_v, bk2_v], axis=0).reshape(4, 1, D)

    Wb = wp @ wq                                                       # (H, 2*heads)
    bb = bp[0] @ wq + bq[0]                                            # (2*heads,)
    Wrc = jnp.stack([Wb[:, 0::2], Wb[:, 1::2]], axis=0)                # (2, H, heads)
    Brc = jnp.stack([bb[0::2], bb[1::2]], axis=0).reshape(2, 1, heads)

    cos, sin = _rope_tables(S_pad, D)

    # padded activations + additive padding masks (-inf rows / cols)
    x_pad = jnp.zeros((B, S_pad, H), jnp.float32).at[:, :S, :].set(inputs.astype(jnp.float32))
    mask_pad = jnp.zeros((B, S_pad), jnp.float32).at[:, :S].set(mask.astype(jnp.float32))
    add_mask = jnp.where(mask_pad > 0, jnp.float32(0.0), jnp.float32(-jnp.inf))
    mrow = add_mask.reshape(B, S_pad, 1)
    mcol = add_mask.reshape(B, 1, S_pad)

    # ---- VMEM budget (explicit, kept well under v7x's 64 MiB) -------------------
    out_block = heads * tm * S_pad * 4
    in_block = (S_pad * H + tm + S_pad + 2 * S_pad * D
                + 4 * H * D + 4 * D + 2 * H * heads + 2 * heads) * 4
    scratch_bytes = (2 * S_pad * _round_up(D, 128)
                     + S_pad * _round_up(heads, 128)
                     + _round_up(heads, 8) * S_pad
                     + tm * S_pad) * 4
    vmem_limit = int(min(max(2 * (out_block + in_block) + scratch_bytes + (4 << 20),
                             32 << 20), 56 << 20))

    grid_spec = pltpu.PrefetchScalarGridSpec(
        num_scalar_prefetch=0,
        grid=(B, n_tiles),
        in_specs=[
            pl.BlockSpec((1, S_pad, H), lambda b, r: (b, 0, 0)),       # x (padded)
            pl.BlockSpec((1, tm, 1), lambda b, r: (b, r, 0)),          # additive row mask
            pl.BlockSpec((1, 1, S_pad), lambda b, r: (b, 0, 0)),       # additive col mask
            pl.BlockSpec((S_pad, D), lambda b, r: (0, 0)),             # cos
            pl.BlockSpec((S_pad, D), lambda b, r: (0, 0)),             # sin
            pl.BlockSpec((4, H, D), lambda b, r: (0, 0, 0)),           # folded q/q_rot/k/k_rot weights
            pl.BlockSpec((4, 1, D), lambda b, r: (0, 0, 0)),           # folded biases
            pl.BlockSpec((2, H, heads), lambda b, r: (0, 0, 0)),       # folded row/col bias weights
            pl.BlockSpec((2, 1, heads), lambda b, r: (0, 0, 0)),       # folded row/col biases
        ],
        out_specs=pl.BlockSpec((1, heads, tm, S_pad), lambda b, r: (b, 0, r, 0)),
        scratch_shapes=[
            pltpu.VMEM((S_pad, D), jnp.float32),       # scaled + RoPE'd q (whole seq)
            pltpu.VMEM((S_pad, D), jnp.float32),       # RoPE'd k (whole seq)
            pltpu.VMEM((S_pad, heads), jnp.float32),   # per-head row bias
            pltpu.VMEM((heads, S_pad), jnp.float32),   # per-head col bias (transposed)
            pltpu.VMEM((tm, S_pad), jnp.float32),      # masked base row tile
        ],
    )

    out_pad = pl.pallas_call(
        _egp_kernel,
        out_shape=jax.ShapeDtypeStruct((B, heads, S_pad, S_pad), jnp.float32),
        grid_spec=grid_spec,
        compiler_params=pltpu.CompilerParams(
            # batch axis is independent -> parallel (megacore); row-tile axis carries the
            # per-batch scratch precompute -> arbitrary (sequential).
            dimension_semantics=("parallel", "arbitrary"),
            vmem_limit_bytes=vmem_limit),
    )(x_pad, mrow, mcol, cos, sin, Wqk, Bqk, Wrc, Brc)

    return out_pad[:, :, :S, :S]


def _reference(inputs, mask, wp, bp, wq, bq, *, heads, head_size):
    """Pure-JAX transcription of the PyTorch forward, for verification."""
    B, S, H = inputs.shape
    D = head_size
    seq_out = inputs @ wp + bp[0]
    qw, kw = seq_out[..., :D], seq_out[..., D:]
    cos, sin = _rope_tables(S, D)

    def rope(x):
        x2 = jnp.stack([-x[..., 1::2], x[..., ::2]], axis=-1).reshape(x.shape)
        return x * cos + x2 * sin

    qw, kw = rope(qw), rope(kw)
    logits = jnp.einsum('bmd,bnd->bmn', qw, kw) / D ** 0.5
    bias_input = seq_out @ wq + bq[0]
    bias = bias_input.reshape(B, S, heads, 2).transpose(0, 2, 1, 3)    # [b, heads, S, 2]
    logits = logits[:, None] + bias[..., :1] + jnp.swapaxes(bias[..., 1:], 2, 3)
    am1 = mask[:, None, :, None]
    am2 = mask[:, None, None, :]
    logits = jnp.where(am1 > 0, logits, -jnp.inf)
    logits = jnp.where(am2 > 0, logits, -jnp.inf)
    tril = jnp.tril(jnp.ones((S, S), jnp.float32), -1)
    return logits - tril * 1e12


if __name__ == "__main__":
    B, S, H = 2, 8, 32
    heads, head_size = 4, 16

    key = jax.random.PRNGKey(0)
    k_in, k_wp, k_bp, k_wq, k_bq = jax.random.split(key, 5)

    inputs = jax.random.normal(k_in, (B, S, H), jnp.float32)

    # Deterministic parameter init (PyTorch Linear-style uniform bounds).
    kp = 1.0 / math.sqrt(H)
    wp = jax.random.uniform(k_wp, (H, 2 * head_size), jnp.float32, -kp, kp)
    bp = jax.random.uniform(k_bp, (1, 2 * head_size), jnp.float32, -kp, kp)
    kq = 1.0 / math.sqrt(2 * head_size)
    wq = jax.random.uniform(k_wq, (2 * head_size, 2 * heads), jnp.float32, -kq, kq)
    bq = jax.random.uniform(k_bq, (1, 2 * heads), jnp.float32, -kq, kq)

    # padding mask: last two positions of batch element 1 are padding
    mask = jnp.ones((B, S), jnp.float32).at[1, S - 2:].set(0.0)

    out = efficient_global_pointer(inputs, mask, wp, bp, wq, bq,
                                   heads=heads, head_size=head_size)
    out = jax.block_until_ready(out)

    ref = _reference(inputs, mask, wp, bp, wq, bq, heads=heads, head_size=head_size)
    assert out.shape == (B, heads, S, S)
    assert np.allclose(np.asarray(out), np.asarray(ref), rtol=1e-4, atol=1e-3), \
        "Pallas kernel does not match reference"

    print("KERNEL_OK")
</pallas_src>

<mosaic_0001>
module attributes {stable_mosaic.version = 11 : i64} {
  func.func @_egp_kernel(%arg0: i32, %arg1: i32, %arg2: memref<1x128x32xf32, #tpu.memory_space<vmem>>, %arg3: memref<1x128x1xf32, #tpu.memory_space<vmem>>, %arg4: memref<1x1x128xf32, #tpu.memory_space<vmem>>, %arg5: memref<128x16xf32, #tpu.memory_space<vmem>>, %arg6: memref<128x16xf32, #tpu.memory_space<vmem>>, %arg7: memref<4x32x16xf32, #tpu.memory_space<vmem>>, %arg8: memref<4x1x16xf32, #tpu.memory_space<vmem>>, %arg9: memref<2x32x4xf32, #tpu.memory_space<vmem>>, %arg10: memref<2x1x4xf32, #tpu.memory_space<vmem>>, %arg11: memref<1x4x128x128xf32, #tpu.memory_space<vmem>>, %arg12: memref<128x16xf32, #tpu.memory_space<vmem>>, %arg13: memref<128x16xf32, #tpu.memory_space<vmem>>, %arg14: memref<128x4xf32, #tpu.memory_space<vmem>>, %arg15: memref<4x128xf32, #tpu.memory_space<vmem>>, %arg16: memref<128x128xf32, #tpu.memory_space<vmem>>) attributes {dimension_semantics = [#tpu.dimension_semantics<parallel>, #tpu.dimension_semantics<arbitrary>], iteration_bounds = array<i64: 2, 1>, scalar_prefetch = 0 : i64, scratch_operands = 5 : i64, tpu.core_type = #tpu.core_type<tc>, window_params = [{transform_indices = @transform_0, window_bounds = array<i64: 1, 128, 32>}, {transform_indices = @transform_1, window_bounds = array<i64: 1, 128, 1>}, {transform_indices = @transform_2, window_bounds = array<i64: 1, 1, 128>}, {pipeline_mode = #tpu.pipeline_mode<synchronous>, transform_indices = @transform_3, window_bounds = array<i64: 128, 16>}, {pipeline_mode = #tpu.pipeline_mode<synchronous>, transform_indices = @transform_4, window_bounds = array<i64: 128, 16>}, {pipeline_mode = #tpu.pipeline_mode<synchronous>, transform_indices = @transform_5, window_bounds = array<i64: 4, 32, 16>}, {pipeline_mode = #tpu.pipeline_mode<synchronous>, transform_indices = @transform_6, window_bounds = array<i64: 4, 1, 16>}, {pipeline_mode = #tpu.pipeline_mode<synchronous>, transform_indices = @transform_7, window_bounds = array<i64: 2, 32, 4>}, {pipeline_mode = #tpu.pipeline_mode<synchronous>, transform_indices = @transform_8, window_bounds = array<i64: 2, 1, 4>}, {transform_indices = @transform_9, window_bounds = array<i64: 1, 4, 128, 128>}]} {
    %c0_i32 = arith.constant 0 : i32
    %0 = arith.cmpi eq, %arg1, %c0_i32 : i32
    %1 = arith.extui %0 : i1 to i32
    %c0_i32_0 = arith.constant 0 : i32
    %2 = arith.cmpi ne, %1, %c0_i32_0 : i32
    scf.if %2 {
      %c0_46 = arith.constant 0 : index
      %c0_47 = arith.constant 0 : index
      %c0_48 = arith.constant 0 : index
      %71 = vector.load %arg2[%c0_46, %c0_47, %c0_48] : memref<1x128x32xf32, #tpu.memory_space<vmem>>, vector<1x128x32xf32>
      %72 = vector.shape_cast %71 : vector<1x128x32xf32> to vector<128x32xf32>
      %c0_49 = arith.constant 0 : index
      %c0_50 = arith.constant 0 : index
      %73 = vector.load %arg5[%c0_49, %c0_50] : memref<128x16xf32, #tpu.memory_space<vmem>>, vector<128x16xf32>
      %c0_51 = arith.constant 0 : index
      %c0_52 = arith.constant 0 : index
      %74 = vector.load %arg6[%c0_51, %c0_52] : memref<128x16xf32, #tpu.memory_space<vmem>>, vector<128x16xf32>
      %c0_53 = arith.constant 0 : index
      %c0_54 = arith.constant 0 : index
      %c0_55 = arith.constant 0 : index
      %75 = vector.load %arg7[%c0_53, %c0_54, %c0_55] : memref<4x32x16xf32, #tpu.memory_space<vmem>>, vector<1x32x16xf32>
      %76 = vector.shape_cast %75 : vector<1x32x16xf32> to vector<32x16xf32>
      %cst_56 = arith.constant dense<0.000000e+00> : vector<128x16xf32>
      %77 = tpu.matmul %72, %76, %cst_56 {dimension_numbers = #tpu.dot_dimension_numbers<[1], [0], [0], [1], [0, 0, 1, 1], [], []>} : vector<128x32xf32>, vector<32x16xf32>, vector<128x16xf32> -> vector<128x16xf32>
      %c0_57 = arith.constant 0 : index
      %c0_58 = arith.constant 0 : index
      %c0_59 = arith.constant 0 : index
      %78 = vector.load %arg8[%c0_57, %c0_58, %c0_59] : memref<4x1x16xf32, #tpu.memory_space<vmem>>, vector<1x1x16xf32>
      %79 = vector.shape_cast %78 : vector<1x1x16xf32> to vector<1x16xf32>
      %80 = vector.broadcast %79 : vector<1x16xf32> to vector<128x16xf32>
      %81 = arith.addf %77, %80 : vector<128x16xf32>
      %c1_60 = arith.constant 1 : index
      %c0_61 = arith.constant 0 : index
      %c0_62 = arith.constant 0 : index
      %82 = vector.load %arg7[%c1_60, %c0_61, %c0_62] : memref<4x32x16xf32, #tpu.memory_space<vmem>>, vector<1x32x16xf32>
      %83 = vector.shape_cast %82 : vector<1x32x16xf32> to vector<32x16xf32>
      %cst_63 = arith.constant dense<0.000000e+00> : vector<128x16xf32>
      %84 = tpu.matmul %72, %83, %cst_63 {dimension_numbers = #tpu.dot_dimension_numbers<[1], [0], [0], [1], [0, 0, 1, 1], [], []>} : vector<128x32xf32>, vector<32x16xf32>, vector<128x16xf32> -> vector<128x16xf32>
      %c1_64 = arith.constant 1 : index
      %c0_65 = arith.constant 0 : index
      %c0_66 = arith.constant 0 : index
      %85 = vector.load %arg8[%c1_64, %c0_65, %c0_66] : memref<4x1x16xf32, #tpu.memory_space<vmem>>, vector<1x1x16xf32>
      %86 = vector.shape_cast %85 : vector<1x1x16xf32> to vector<1x16xf32>
      %87 = vector.broadcast %86 : vector<1x16xf32> to vector<128x16xf32>
      %88 = arith.addf %84, %87 : vector<128x16xf32>
      %c2_67 = arith.constant 2 : index
      %c0_68 = arith.constant 0 : index
      %c0_69 = arith.constant 0 : index
      %89 = vector.load %arg7[%c2_67, %c0_68, %c0_69] : memref<4x32x16xf32, #tpu.memory_space<vmem>>, vector<1x32x16xf32>
      %90 = vector.shape_cast %89 : vector<1x32x16xf32> to vector<32x16xf32>
      %cst_70 = arith.constant dense<0.000000e+00> : vector<128x16xf32>
      %91 = tpu.matmul %72, %90, %cst_70 {dimension_numbers = #tpu.dot_dimension_numbers<[1], [0], [0], [1], [0, 0, 1, 1], [], []>} : vector<128x32xf32>, vector<32x16xf32>, vector<128x16xf32> -> vector<128x16xf32>
      %c2_71 = arith.constant 2 : index
      %c0_72 = arith.constant 0 : index
      %c0_73 = arith.constant 0 : index
      %92 = vector.load %arg8[%c2_71, %c0_72, %c0_73] : memref<4x1x16xf32, #tpu.memory_space<vmem>>, vector<1x1x16xf32>
      %93 = vector.shape_cast %92 : vector<1x1x16xf32> to vector<1x16xf32>
      %94 = vector.broadcast %93 : vector<1x16xf32> to vector<128x16xf32>
      %95 = arith.addf %91, %94 : vector<128x16xf32>
      %c3_74 = arith.constant 3 : index
      %c0_75 = arith.constant 0 : index
      %c0_76 = arith.constant 0 : index
      %96 = vector.load %arg7[%c3_74, %c0_75, %c0_76] : memref<4x32x16xf32, #tpu.memory_space<vmem>>, vector<1x32x16xf32>
      %97 = vector.shape_cast %96 : vector<1x32x16xf32> to vector<32x16xf32>
      %cst_77 = arith.constant dense<0.000000e+00> : vector<128x16xf32>
      %98 = tpu.matmul %72, %97, %cst_77 {dimension_numbers = #tpu.dot_dimension_numbers<[1], [0], [0], [1], [0, 0, 1, 1], [], []>} : vector<128x32xf32>, vector<32x16xf32>, vector<128x16xf32> -> vector<128x16xf32>
      %c3_78 = arith.constant 3 : index
      %c0_79 = arith.constant 0 : index
      %c0_80 = arith.constant 0 : index
      %99 = vector.load %arg8[%c3_78, %c0_79, %c0_80] : memref<4x1x16xf32, #tpu.memory_space<vmem>>, vector<1x1x16xf32>
      %100 = vector.shape_cast %99 : vector<1x1x16xf32> to vector<1x16xf32>
      %101 = vector.broadcast %100 : vector<1x16xf32> to vector<128x16xf32>
      %102 = arith.addf %98, %101 : vector<128x16xf32>
      %103 = arith.mulf %81, %73 : vector<128x16xf32>
      %104 = arith.mulf %88, %74 : vector<128x16xf32>
      %105 = arith.addf %103, %104 : vector<128x16xf32>
      %c0_81 = arith.constant 0 : index
      %c0_82 = arith.constant 0 : index
      %106 = vector.load %arg12[%c0_81, %c0_82] : memref<128x16xf32, #tpu.memory_space<vmem>>, vector<128x16xf32>
      tpu.vector_store %arg12[%c0_81, %c0_82], %105 {strides = array<i32>} : memref<128x16xf32, #tpu.memory_space<vmem>>, vector<128x16xf32>,
      %107 = arith.mulf %95, %73 : vector<128x16xf32>
      %108 = arith.mulf %102, %74 : vector<128x16xf32>
      %109 = arith.addf %107, %108 : vector<128x16xf32>
      %c0_83 = arith.constant 0 : index
      %c0_84 = arith.constant 0 : index
      %110 = vector.load %arg13[%c0_83, %c0_84] : memref<128x16xf32, #tpu.memory_space<vmem>>, vector<128x16xf32>
      tpu.vector_store %arg13[%c0_83, %c0_84], %109 {strides = array<i32>} : memref<128x16xf32, #tpu.memory_space<vmem>>, vector<128x16xf32>,
      %c0_85 = arith.constant 0 : index
      %c0_86 = arith.constant 0 : index
      %c0_87 = arith.constant 0 : index
      %111 = vector.load %arg9[%c0_85, %c0_86, %c0_87] : memref<2x32x4xf32, #tpu.memory_space<vmem>>, vector<1x32x4xf32>
      %112 = vector.shape_cast %111 : vector<1x32x4xf32> to vector<32x4xf32>
      %cst_88 = arith.constant dense<0.000000e+00> : vector<128x4xf32>
      %113 = tpu.matmul %72, %112, %cst_88 {dimension_numbers = #tpu.dot_dimension_numbers<[1], [0], [0], [1], [0, 0, 1, 1], [], []>} : vector<128x32xf32>, vector<32x4xf32>, vector<128x4xf32> -> vector<128x4xf32>
      %c0_89 = arith.constant 0 : index
      %c0_90 = arith.constant 0 : index
      %c0_91 = arith.constant 0 : index
      %114 = vector.load %arg10[%c0_89, %c0_90, %c0_91] : memref<2x1x4xf32, #tpu.memory_space<vmem>>, vector<1x1x4xf32>
      %115 = vector.shape_cast %114 : vector<1x1x4xf32> to vector<1x4xf32>
      %116 = vector.broadcast %115 : vector<1x4xf32> to vector<128x4xf32>
      %117 = arith.addf %113, %116 : vector<128x4xf32>
      %c0_92 = arith.constant 0 : index
      %c0_93 = arith.constant 0 : index
      %118 = vector.load %arg14[%c0_92, %c0_93] : memref<128x4xf32, #tpu.memory_space<vmem>>, vector<128x4xf32>
      tpu.vector_store %arg14[%c0_92, %c0_93], %117 {strides = array<i32>} : memref<128x4xf32, #tpu.memory_space<vmem>>, vector<128x4xf32>,
      %c1_94 = arith.constant 1 : index
      %c0_95 = arith.constant 0 : index
      %c0_96 = arith.constant 0 : index
      %119 = vector.load %arg9[%c1_94, %c0_95, %c0_96] : memref<2x32x4xf32, #tpu.memory_space<vmem>>, vector<1x32x4xf32>
      %120 = vector.shape_cast %119 : vector<1x32x4xf32> to vector<32x4xf32>
      %cst_97 = arith.constant dense<0.000000e+00> : vector<128x4xf32>
      %121 = tpu.matmul %72, %120, %cst_97 {dimension_numbers = #tpu.dot_dimension_numbers<[1], [0], [0], [1], [0, 0, 1, 1], [], []>} : vector<128x32xf32>, vector<32x4xf32>, vector<128x4xf32> -> vector<128x4xf32>
      %c1_98 = arith.constant 1 : index
      %c0_99 = arith.constant 0 : index
      %c0_100 = arith.constant 0 : index
      %122 = vector.load %arg10[%c1_98, %c0_99, %c0_100] : memref<2x1x4xf32, #tpu.memory_space<vmem>>, vector<1x1x4xf32>
      %123 = vector.shape_cast %122 : vector<1x1x4xf32> to vector<1x4xf32>
      %124 = vector.broadcast %123 : vector<1x4xf32> to vector<128x4xf32>
      %125 = arith.addf %121, %124 : vector<128x4xf32>
      %126 = tpu.transpose %125, [1, 0] : vector<128x4xf32> -> vector<4x128xf32>
      %c0_101 = arith.constant 0 : index
      %c0_102 = arith.constant 0 : index
      %127 = vector.load %arg15[%c0_101, %c0_102] : memref<4x128xf32, #tpu.memory_space<vmem>>, vector<4x128xf32>
      tpu.vector_store %arg15[%c0_101, %c0_102], %126 {strides = array<i32>} : memref<4x128xf32, #tpu.memory_space<vmem>>, vector<4x128xf32>,
    } else {
    }
    %c128_i32 = arith.constant 128 : i32
    %3 = arith.muli %arg1, %c128_i32 : i32
    %4 = tpu.assume_multiple %3, 128 : i32
    %5 = arith.index_cast %4 : i32 to index
    %c0 = arith.constant 0 : index
    %6 = vector.load %arg12[%5, %c0] : memref<128x16xf32, #tpu.memory_space<vmem>>, vector<128x16xf32>
    %c0_1 = arith.constant 0 : index
    %c0_2 = arith.constant 0 : index
    %7 = vector.load %arg13[%c0_1, %c0_2] : memref<128x16xf32, #tpu.memory_space<vmem>>, vector<128x16xf32>
    %cst = arith.constant dense<0.000000e+00> : vector<128x128xf32>
    %8 = tpu.matmul %6, %7, %cst {dimension_numbers = #tpu.dot_dimension_numbers<[1], [1], [0], [0], [0, 0, 1, 0], [], []>} : vector<128x16xf32>, vector<128x16xf32>, vector<128x128xf32> -> vector<128x128xf32>
    %9 = tpu.iota {dimensions = array<i32: 0>} : vector<128x128xi32>
    %10 = vector.broadcast %4 : i32 to vector<128x128xi32>
    %11 = arith.addi %10, %9 : vector<128x128xi32>
    %12 = tpu.iota {dimensions = array<i32: 1>} : vector<128x128xi32>
    %13 = arith.cmpi sgt, %11, %12 : vector<128x128xi32>
    %cst_3 = arith.constant 9.99999995E+11 : f32
    %cst_4 = arith.constant 0.000000e+00 : f32
    %14 = vector.broadcast %cst_3 : f32 to vector<128x128xf32>
    %15 = vector.broadcast %cst_4 : f32 to vector<128x128xf32>
    %16 = arith.select %13, %14, %15 : vector<128x128xi1>, vector<128x128xf32>
    %c0_5 = arith.constant 0 : index
    %c0_6 = arith.constant 0 : index
    %c0_7 = arith.constant 0 : index
    %17 = vector.load %arg3[%c0_5, %c0_6, %c0_7] : memref<1x128x1xf32, #tpu.memory_space<vmem>>, vector<1x128x1xf32>
    %18 = vector.shape_cast %17 : vector<1x128x1xf32> to vector<128x1xf32>
    %19 = vector.broadcast %18 : vector<128x1xf32> to vector<128x128xf32>
    %20 = arith.addf %8, %19 : vector<128x128xf32>
    %c0_8 = arith.constant 0 : index
    %c0_9 = arith.constant 0 : index
    %c0_10 = arith.constant 0 : index
    %21 = vector.load %arg4[%c0_8, %c0_9, %c0_10] : memref<1x1x128xf32, #tpu.memory_space<vmem>>, vector<1x1x128xf32>
    %22 = vector.shape_cast %21 : vector<1x1x128xf32> to vector<1x128xf32>
    %23 = vector.broadcast %22 : vector<1x128xf32> to vector<128x128xf32>
    %24 = arith.addf %20, %23 : vector<128x128xf32>
    %25 = arith.subf %24, %16 : vector<128x128xf32>
    %c0_11 = arith.constant 0 : index
    %c0_12 = arith.constant 0 : index
    %26 = vector.load %arg16[%c0_11, %c0_12] : memref<128x128xf32, #tpu.memory_space<vmem>>, vector<128x128xf32>
    tpu.vector_store %arg16[%c0_11, %c0_12], %25 {strides = array<i32>} : memref<128x128xf32, #tpu.memory_space<vmem>>, vector<128x128xf32>,
    %27 = arith.index_cast %4 : i32 to index
    %c0_13 = arith.constant 0 : index
    %28 = vector.load %arg14[%27, %c0_13] : memref<128x4xf32, #tpu.memory_space<vmem>>, vector<128x1xf32>
    %c0_14 = arith.constant 0 : index
    %c0_15 = arith.constant 0 : index
    %29 = vector.load %arg15[%c0_14, %c0_15] : memref<4x128xf32, #tpu.memory_space<vmem>>, vector<1x128xf32>
    %c0_16 = arith.constant 0 : index
    %c0_17 = arith.constant 0 : index
    %30 = vector.load %arg16[%c0_16, %c0_17] : memref<128x128xf32, #tpu.memory_space<vmem>>, vector<128x128xf32>
    %31 = vector.broadcast %28 : vector<128x1xf32> to vector<128x128xf32>
    %32 = arith.addf %30, %31 : vector<128x128xf32>
    %33 = vector.broadcast %29 : vector<1x128xf32> to vector<128x128xf32>
    %34 = arith.addf %32, %33 : vector<128x128xf32>
    %c0_18 = arith.constant 0 : index
    %c0_19 = arith.constant 0 : index
    %c0_20 = arith.constant 0 : index
    %c0_21 = arith.constant 0 : index
    %35 = vector.load %arg11[%c0_18, %c0_19, %c0_20, %c0_21] : memref<1x4x128x128xf32, #tpu.memory_space<vmem>>, vector<1x1x128x128xf32>
    %36 = vector.shape_cast %35 : vector<1x1x128x128xf32> to vector<128x128xf32>
    %37 = vector.shape_cast %34 : vector<128x128xf32> to vector<1x1x128x128xf32>
    tpu.vector_store %arg11[%c0_18, %c0_19, %c0_20, %c0_21], %37 {strides = array<i32>} : memref<1x4x128x128xf32, #tpu.memory_space<vmem>>, vector<1x1x128x128xf32>,
    %38 = arith.index_cast %4 : i32 to index
    %c1 = arith.constant 1 : index
    %39 = vector.load %arg14[%38, %c1] : memref<128x4xf32, #tpu.memory_space<vmem>>, vector<128x1xf32>
    %c1_22 = arith.constant 1 : index
    %c0_23 = arith.constant 0 : index
    %40 = vector.load %arg15[%c1_22, %c0_23] : memref<4x128xf32, #tpu.memory_space<vmem>>, vector<1x128xf32>
    %c0_24 = arith.constant 0 : index
    %c0_25 = arith.constant 0 : index
    %41 = vector.load %arg16[%c0_24, %c0_25] : memref<128x128xf32, #tpu.memory_space<vmem>>, vector<128x128xf32>
    %42 = vector.broadcast %39 : vector<128x1xf32> to vector<128x128xf32>
    %43 = arith.addf %41, %42 : vector<128x128xf32>
    %44 = vector.broadcast %40 : vector<1x128xf32> to vector<128x128xf32>
    %45 = arith.addf %43, %44 : vector<128x128xf32>
    %c0_26 = arith.constant 0 : index
    %c1_27 = arith.constant 1 : index
    %c0_28 = arith.constant 0 : index
    %c0_29 = arith.constant 0 : index
    %46 = vector.load %arg11[%c0_26, %c1_27, %c0_28, %c0_29] : memref<1x4x128x128xf32, #tpu.memory_space<vmem>>, vector<1x1x128x128xf32>
    %47 = vector.shape_cast %46 : vector<1x1x128x128xf32> to vector<128x128xf32>
    %48 = vector.shape_cast %45 : vector<128x128xf32> to vector<1x1x128x128xf32>
    tpu.vector_store %arg11[%c0_26, %c1_27, %c0_28, %c0_29], %48 {strides = array<i32>} : memref<1x4x128x128xf32, #tpu.memory_space<vmem>>, vector<1x1x128x128xf32>,
    %49 = arith.index_cast %4 : i32 to index
    %c2 = arith.constant 2 : index
    %50 = vector.load %arg14[%49, %c2] : memref<128x4xf32, #tpu.memory_space<vmem>>, vector<128x1xf32>
    %c2_30 = arith.constant 2 : index
    %c0_31 = arith.constant 0 : index
    %51 = vector.load %arg15[%c2_30, %c0_31] : memref<4x128xf32, #tpu.memory_space<vmem>>, vector<1x128xf32>
    %c0_32 = arith.constant 0 : index
    %c0_33 = arith.constant 0 : index
    %52 = vector.load %arg16[%c0_32, %c0_33] : memref<128x128xf32, #tpu.memory_space<vmem>>, vector<128x128xf32>
    %53 = vector.broadcast %50 : vector<128x1xf32> to vector<128x128xf32>
    %54 = arith.addf %52, %53 : vector<128x128xf32>
    %55 = vector.broadcast %51 : vector<1x128xf32> to vector<128x128xf32>
    %56 = arith.addf %54, %55 : vector<128x128xf32>
    %c0_34 = arith.constant 0 : index
    %c2_35 = arith.constant 2 : index
    %c0_36 = arith.constant 0 : index
    %c0_37 = arith.constant 0 : index
    %57 = vector.load %arg11[%c0_34, %c2_35, %c0_36, %c0_37] : memref<1x4x128x128xf32, #tpu.memory_space<vmem>>, vector<1x1x128x128xf32>
    %58 = vector.shape_cast %57 : vector<1x1x128x128xf32> to vector<128x128xf32>
    %59 = vector.shape_cast %56 : vector<128x128xf32> to vector<1x1x128x128xf32>
    tpu.vector_store %arg11[%c0_34, %c2_35, %c0_36, %c0_37], %59 {strides = array<i32>} : memref<1x4x128x128xf32, #tpu.memory_space<vmem>>, vector<1x1x128x128xf32>,
    %60 = arith.index_cast %4 : i32 to index
    %c3 = arith.constant 3 : index
    %61 = vector.load %arg14[%60, %c3] : memref<128x4xf32, #tpu.memory_space<vmem>>, vector<128x1xf32>
    %c3_38 = arith.constant 3 : index
    %c0_39 = arith.constant 0 : index
    %62 = vector.load %arg15[%c3_38, %c0_39] : memref<4x128xf32, #tpu.memory_space<vmem>>, vector<1x128xf32>
    %c0_40 = arith.constant 0 : index
    %c0_41 = arith.constant 0 : index
    %63 = vector.load %arg16[%c0_40, %c0_41] : memref<128x128xf32, #tpu.memory_space<vmem>>, vector<128x128xf32>
    %64 = vector.broadcast %61 : vector<128x1xf32> to vector<128x128xf32>
    %65 = arith.addf %63, %64 : vector<128x128xf32>
    %66 = vector.broadcast %62 : vector<1x128xf32> to vector<128x128xf32>
    %67 = arith.addf %65, %66 : vector<128x128xf32>
    %c0_42 = arith.constant 0 : index
    %c3_43 = arith.constant 3 : index
    %c0_44 = arith.constant 0 : index
    %c0_45 = arith.constant 0 : index
    %68 = vector.load %arg11[%c0_42, %c3_43, %c0_44, %c0_45] : memref<1x4x128x128xf32, #tpu.memory_space<vmem>>, vector<1x1x128x128xf32>
    %69 = vector.shape_cast %68 : vector<1x1x128x128xf32> to vector<128x128xf32>
    %70 = vector.shape_cast %67 : vector<128x128xf32> to vector<1x1x128x128xf32>
    tpu.vector_store %arg11[%c0_42, %c3_43, %c0_44, %c0_45], %70 {strides = array<i32>} : memref<1x4x128x128xf32, #tpu.memory_space<vmem>>, vector<1x1x128x128xf32>,
    return
  }
  func.func @transform_0(%arg0: i32, %arg1: i32) -> (i32, i32, i32) {
    %c0_i32 = arith.constant 0 : i32
    %c0_i32_0 = arith.constant 0 : i32
    %c0_i32_1 = arith.constant 0 : i32
    return %arg0, %c0_i32, %c0_i32_0 : i32, i32, i32
  }
  func.func @transform_1(%arg0: i32, %arg1: i32) -> (i32, i32, i32) {
    %c0_i32 = arith.constant 0 : i32
    %c0_i32_0 = arith.constant 0 : i32
    return %arg0, %arg1, %c0_i32 : i32, i32, i32
  }
  func.func @transform_2(%arg0: i32, %arg1: i32) -> (i32, i32, i32) {
    %c0_i32 = arith.constant 0 : i32
    %c0_i32_0 = arith.constant 0 : i32
    %c0_i32_1 = arith.constant 0 : i32
    return %arg0, %c0_i32, %c0_i32_0 : i32, i32, i32
  }
  func.func @transform_3(%arg0: i32, %arg1: i32) -> (i32, i32) {
    %c0_i32 = arith.constant 0 : i32
    %c0_i32_0 = arith.constant 0 : i32
    %c0_i32_1 = arith.constant 0 : i32
    return %c0_i32, %c0_i32_0 : i32, i32
  }
  func.func @transform_4(%arg0: i32, %arg1: i32) -> (i32, i32) {
    %c0_i32 = arith.constant 0 : i32
    %c0_i32_0 = arith.constant 0 : i32
    %c0_i32_1 = arith.constant 0 : i32
    return %c0_i32, %c0_i32_0 : i32, i32
  }
  func.func @transform_5(%arg0: i32, %arg1: i32) -> (i32, i32, i32) {
    %c0_i32 = arith.constant 0 : i32
    %c0_i32_0 = arith.constant 0 : i32
    %c0_i32_1 = arith.constant 0 : i32
    %c0_i32_2 = arith.constant 0 : i32
    return %c0_i32, %c0_i32_0, %c0_i32_1 : i32, i32, i32
  }
  func.func @transform_6(%arg0: i32, %arg1: i32) -> (i32, i32, i32) {
    %c0_i32 = arith.constant 0 : i32
    %c0_i32_0 = arith.constant 0 : i32
    %c0_i32_1 = arith.constant 0 : i32
    %c0_i32_2 = arith.constant 0 : i32
    return %c0_i32, %c0_i32_0, %c0_i32_1 : i32, i32, i32
  }
  func.func @transform_7(%arg0: i32, %arg1: i32) -> (i32, i32, i32) {
    %c0_i32 = arith.constant 0 : i32
    %c0_i32_0 = arith.constant 0 : i32
    %c0_i32_1 = arith.constant 0 : i32
    %c0_i32_2 = arith.constant 0 : i32
    return %c0_i32, %c0_i32_0, %c0_i32_1 : i32, i32, i32
  }
  func.func @transform_8(%arg0: i32, %arg1: i32) -> (i32, i32, i32) {
    %c0_i32 = arith.constant 0 : i32
    %c0_i32_0 = arith.constant 0 : i32
    %c0_i32_1 = arith.constant 0 : i32
    %c0_i32_2 = arith.constant 0 : i32
    return %c0_i32, %c0_i32_0, %c0_i32_1 : i32, i32, i32
  }
  func.func @transform_9(%arg0: i32, %arg1: i32) -> (i32, i32, i32, i32) {
    %c0_i32 = arith.constant 0 : i32
    %c0_i32_0 = arith.constant 0 : i32
    %c0_i32_1 = arith.constant 0 : i32
    return %arg0, %c0_i32, %arg1, %c0_i32_0 : i32, i32, i32, i32
  }
}

</mosaic_0001>

<bundles_post_ra>
// kernel: tpu_custom_call.1
= control target key start
LH: loop header
LB: loop body
LE: loop exit
PB: predicated region body
PF: predicated region fallthrough
CT: control target
= control target key end

     0   :  { %14 = vsyncpa [#allocation8], 0  ;;  %s5622_s0 = inlined_call_operand.vmem [shape: f32[2,128,32], index: 0, kind: input, shape index: {}]   ;;  %s5623_s1 = inlined_call_operand.vmem [shape: f32[2,128,1], index: 1, kind: input, shape index: {}]   ;;  %s5624_s2 = inlined_call_operand.vmem [shape: f32[2,1,128], index: 2, kind: input, shape index: {}]   ;;  %s5625_s3 = inlined_call_operand.vmem [shape: f32[128,16], index: 3, kind: input, shape index: {}]   ;;  %s5626_s4 = inlined_call_operand.vmem [shape: f32[128,16], index: 4, kind: input, shape index: {}]   ;;  %s5627_s5 = inlined_call_operand.vmem [shape: f32[4,32,16], index: 5, kind: input, shape index: {}]   ;;  %s5628_s6 = inlined_call_operand.vmem [shape: f32[4,1,16], index: 6, kind: input, shape index: {}]   ;;  %s5629_s7 = inlined_call_operand.vmem [shape: f32[2,32,4], index: 7, kind: input, shape index: {}]   ;;  %s5630_s8 = inlined_call_operand.vmem [shape: f32[2,1,4], index: 8, kind: input, shape index: {}]   ;;  %s5631_s9 = inlined_call_operand.hbm [shape: f32[2,4,128,128], index: 9, kind: output, shape index: {}]  }
   0x1   :  { %16 = vsyncpa [#allocation8 + $0x1], 0  ;;  %s3884_s30 = smov 0   ;;  %s3886_s10 = smov 0  }
   0x2   :  { %s3888_s11 = smov 0   ;;  %s3890_s12 = smov 0  }
   0x3   :  { %s3892_s13 = smov 0   ;;  %s3894_s14 = smov 0  }
   0x4 LB: > { %s2899_s15 = sadd.s32 4294967295, %s3824_s14   ;;  %s2900_s16 = sadd.s32 4294967294, %s3824_s14   ;;  %s3824_s14 = sphi %s3894_s14, %s22_s14   ;;  %s3820_s13 = sphi %s3892_s13, %s5750_s13   ;;  %s3816_s12 = sphi %s3890_s12, %s5749_s12   ;;  %s3812_s11 = sphi %s3888_s11, %s5748_s11   ;;  %s3808_s10 = sphi %s3886_s10, %s5747_s10   ;;  %s3804_s30 = sphi %s3884_s30, %s5746_s30  }
   0x5   : > { %s34_s17 = sadd.s32 1, %s3820_s13  ;;  %s249_s18 = sadd.s32 1, %s3812_s11 }
   0x6   : > { %p36_p0 = scmp.ge.s32.totalorder %s34_s17, 2  ;;  %p259_p1 = scmp.ne.s32.totalorder %s3812_s11, %s3808_s10 }
   0x7   : > { %p260_p2 = scmp.eq.s32.totalorder %s2899_s15, 1  ;;  %p265_p3 = scmp.ne.s32.totalorder %s3808_s10, %s3804_s30 }
   0x8   : > { %s5752_s17 = smov (%p36_p0, %s34_s17), 0  ;;  %p266_p5 = scmp.eq.s32.totalorder %s2900_s16, 1 }
   0x9   : > { %p3924_p4 = por %p260_p2, %p259_p1  ;;  %s244_s20 = ssub.s32 %s3820_s13, %s5752_s17 }
   0xa   : > { %p2903_p6 = scmp.ge.s32.totalorder %s3824_s14, 1  ;;  %p247_p7 = scmp.eq.s32.totalorder %s244_s20, 0 }
   0xb   : > { %p3931_p8 = por %p266_p5, %p265_p3  ;;  %p329_p9 = scmp.lt.s32.totalorder %s3824_s14, 3 }
   0xc   : > { %s3937_s22 = scalar_select %p247_p7, %s3812_s11, %s249_s18  }
   0xd   : > { %p330_p10 = pnand %p2903_p6, %p329_p9 }
   0xf   : > { %333 = sbr.rel (%p330_p10) target bundleno = 689 (0x2b1), region = 56 }
  0x16   : > { %v448_v0 = vld [vmem:[%s5627_s5] sm:$0xff]  ;;  %v449_v1 = vld [vmem:[%s5627_s5 + $0x8] sm:$0xff]  ;;  %p377_p11 = scmp.lt.s32.totalorder %s3816_s12, 1  ;;  %v450_v5 = vld [vmem:[%s5627_s5 + $0x10] sm:$0xff]  ;;  %v5632_v7 = vmov 0   ;;  %vm459_vm0 = vcmask 261120  }
  0x17   : > { %v2948_v2 = vld [vmem:[%s5627_s5 + $0x40] sm:$0xff]  ;;  %v3524_v3 = vpack.c.bf16 %v449_v1, %v448_v0  ;;  %v2949_v4 = vld [vmem:[%s5627_s5 + $0x48] sm:$0xff]  ;;  %v451_v6 = vld [vmem:[%s5627_s5 + $0x18] sm:$0xff]  ;;  %3682 = vset.pattern.permute.xlu1 %v5632_v7  ;;  %vm1412_vm1 = vcmask 31744   ;;  %vm1175_vm2 = vcmask 130048   ;;  %s3123_s18 = sshll.u32 %s3816_s12, 13 }
  0x18   : > { %v3540_v8 = vpack.c.bf16 %v2949_v4, %v2948_v2  ;;  %v3528_v9 = vpack.c.bf16 %v451_v6, %v450_v5  ;;  %v2950_v10 = vld [vmem:[%s5627_s5 + $0x50] sm:$0xff]  ;;  %v2951_v11 = vld [vmem:[%s5627_s5 + $0x58] sm:$0xff]  ;;  %s3966_s28 = scalar_select %p377_p11, %s3816_s12, 1  ;;  %v1256_v13 = vld [vmem:[%s5629_s7] sm:$0xff]  ;;  %v5638_v5 = vmov 2  }
  0x19   : > { %3525 = vmatprep.subr.bf16.mxu1 %v3524_v3  ;;  %v3544_v12 = vpack.c.bf16 %v2951_v11, %v2950_v10  ;;  %v1257_v14 = vld [vmem:[%s5629_s7 + $0x8] sm:$0xff]  ;;  %v2926_v15 = vld [vmem:[%s5627_s5 + $0x20] sm:$0xff]  ;;  %v1258_v20 = vld [vmem:[%s5629_s7 + $0x10] sm:$0xff]  ;;  %3684 = vset.pattern.permute.xlu0 %v5638_v5  ;;  %s5568_s25 = scalar_lea.hbm %s5631_s9, %s3123_s18 }
  0x1a   : > { %3541 = vmatprep.subr.bf16.mxu0 %v3540_v8  ;;  %3527 = vmatpush3.bf16.msra.mxu1 %v3524_v3  ;;  %s3121_s20 = sshll.u32 %s3966_s28, 7  ;;  %v2927_v16 = vld [vmem:[%s5627_s5 + $0x28] sm:$0xff]  ;;  %v3556_v19 = vpack.c.bf16 %v1257_v14, %v1256_v13  ;;  %v1259_v21 = vld [vmem:[%s5629_s7 + $0x18] sm:$0xff]  ;;  %v2928_v23 = vld [vmem:[%s5627_s5 + $0x30] sm:$0xff]  ;;  %s394_s29 = scalar_lea.vmem %s5624_s2, %s3966_s28 }
  0x1b   : > { %3543 = vmatpush3.bf16.msra.mxu0 %v3540_v8  ;;  %3529 = vmatprep.subr.bf16.mxu1 %v3528_v9  ;;  %s3986_s15 = scalar_lea.vmem %s5622_s0, %s3121_s20  ;;  %v3532_v17 = vpack.c.bf16 %v2927_v16, %v2926_v15  ;;  %v2929_v24 = vld [vmem:[%s5627_s5 + $0x38] sm:$0xff]  ;;  %v3560_v26 = vpack.c.bf16 %v1259_v21, %v1258_v20  ;;  %v2970_v29 = vld [vmem:[%s5627_s5 + $0x60] sm:$0xff]  ;;  %v2971_v30 = vld [vmem:[%s5627_s5 + $0x68] sm:$0xff]  ;;  %s4033_s27 = scalar_lea.vmem %s5623_s1, %s3121_s20 }
  0x1c   : > { %3545 = vmatprep.subr.bf16.mxu0 %v3544_v12  ;;  %v3989_v18 = vld [vmem:[%s3986_s15] sm:$0xff]  ;;  %v4002_v22 = vld [vmem:[%s3986_s15 + $0x8] sm:$0xff]  ;;  %v4011_v25 = vld [vmem:[%s3986_s15 + $0x10] sm:$0xff]  ;;  %v3536_v27 = vpack.c.bf16 %v2929_v24, %v2928_v23  ;;  %v4042_v32 = vpack.c.bf16 %v2971_v30, %v2970_v29  ;;  %s374_s28 = sand.u32 1, %s3808_s10   ;;  %s3831_s20 = smov [#allocation7]  }
  0x1d   : > { %3284 = vmatprep.mubr.msk.f32.mxu1 %vm459_vm0, %v3989_v18  ;;  %3348 = vmatprep.mubr.msk.f32.mxu0 %vm459_vm0, %v3989_v18  ;;  %v4020_v28 = vld [vmem:[%s3986_s15 + $0x18] sm:$0xff]  ;;  %v4038_v31 = vld [vmem:[%s3986_s15 + $0x20] sm:$0xff]  ;;  %v4050_v34 = vld [vmem:[%s3986_s15 + $0x28] sm:$0xff]  ;;  %s5250_s16 = sshll.u32 %s374_s28, 9  ;;  %s5576_s26 = scalar_lea.sflag [#allocation8], %s374_s28 }
  0x1e   : > { %3531 = vmatpush3.bf16.msra.mxu1 %v3528_v9  ;;  %v1722_v33 = vld [vmem:[%s4033_s27] sm:$0xff]  ;;  %v4055_v35 = vld [vmem:[%s3986_s15 + $0x30] sm:$0xff]  ;;  %v1723_v36 = vld [vmem:[%s4033_s27 + $0x8] sm:$0xff] }
  0x1f   : > { %3547 = vmatpush3.bf16.msra.mxu0 %v3544_v12  ;;  %3533 = vmatprep.subr.bf16.mxu1 %v3532_v17  ;;  %v4066_v37 = vld [vmem:[%s3986_s15 + $0x38] sm:$0xff]  ;;  %v4071_v38 = vld [vmem:[%s3986_s15 + $0x40] sm:$0xff]  ;;  %v1724_v39 = vld [vmem:[%s4033_s27 + $0x10] sm:$0xff] }
  0x20   : > { %3557 = vmatprep.subr.bf16.mxu0 %v3556_v19  ;;  %1740 = vperm.xlu1 %3682, %v1722_v33   ;;  %v4081_v40 = vld [vmem:[%s3986_s15 + $0x48] sm:$0xff]  ;;  %v4086_v41 = vld [vmem:[%s3986_s15 + $0x50] sm:$0xff]  ;;  %v1725_v42 = vld [vmem:[%s4033_s27 + $0x18] sm:$0xff] }
  0x21   : > { %3285 = vmatmul.mubr.msk.f32.vlgmr.msra.gmra.mrb[0].mxu1 %vm459_vm0, %v4002_v22  ;;  %v4096_v43 = vld [vmem:[%s3986_s15 + $0x58] sm:$0xff]  ;;  %v4101_v44 = vld [vmem:[%s3986_s15 + $0x60] sm:$0xff]  ;;  %v4111_v46 = vld [vmem:[%s3986_s15 + $0x68] sm:$0xff] }
  0x22   : > { %3349 = vmatmul.mubr.msk.f32.vlgmr.msra.gmra.mrb[0].mxu0 %vm459_vm0, %v4002_v22  ;;  %3287 = vmatprep.mubr.msk.f32.mxu1 %vm459_vm0, %v4011_v25  ;;  %v1726_v45 = vld [vmem:[%s4033_s27 + $0x20] sm:$0xff]  ;;  %v4116_v47 = vld [vmem:[%s3986_s15 + $0x70] sm:$0xff]  ;;  %v1727_v48 = vld [vmem:[%s4033_s27 + $0x28] sm:$0xff] }
  0x23   : > { %3559 = vmatpush3.bf16.msra.mxu0 %v3556_v19  ;;  %3351 = vmatprep.mubr.msk.f32.mxu0 %vm459_vm0, %v4011_v25  ;;  %v4126_v49 = vld [vmem:[%s3986_s15 + $0x78] sm:$0xff]  ;;  %v2972_v50 = vld [vmem:[%s5627_s5 + $0x70] sm:$0xff]  ;;  %v3009_v53 = vld [vmem:[%s5629_s7 + $0x20] sm:$0xff] }
  0x24   : > { %3561 = vmatprep.subr.bf16.mxu0 %v3560_v26  ;;  %3535 = vmatpush3.bf16.msra.mxu1 %v3532_v17  ;;  %v2973_v51 = vld [vmem:[%s5627_s5 + $0x78] sm:$0xff]  ;;  %v3010_v54 = vld [vmem:[%s5629_s7 + $0x28] sm:$0xff]  ;;  %v3011_v56 = vld [vmem:[%s5629_s7 + $0x30] sm:$0xff] }
  0x25   : > { %3288 = vmatmul.mubr.msk.f32.gmra.mrb[2].mxu1 %vm459_vm0, %v4020_v28  ;;  %3537 = vmatprep.subr.bf16.mxu1 %v3536_v27  ;;  %v3552_v52 = vpack.c.bf16 %v2973_v51, %v2972_v50  ;;  %v3564_v55 = vpack.c.bf16 %v3010_v54, %v3009_v53  ;;  %v3012_v57 = vld [vmem:[%s5629_s7 + $0x38] sm:$0xff]  ;;  %v1728_v59 = vld [vmem:[%s4033_s27 + $0x30] sm:$0xff]  ;;  %v1730_v61 = vld [vmem:[%s4033_s27 + $0x40] sm:$0xff] }
  0x26   : > { %3352 = vmatmul.mubr.msk.f32.gmra.mrb[2].mxu0 %vm459_vm0, %v4020_v28  ;;  %3290 = vmatprep.mubr.msk.f32.mxu1 %vm459_vm0, %v4038_v31  ;;  %v3568_v58 = vpack.c.bf16 %v3012_v57, %v3011_v56  ;;  %v1729_v60 = vld [vmem:[%s4033_s27 + $0x38] sm:$0xff]  ;;  %v1731_v62 = vld [vmem:[%s4033_s27 + $0x48] sm:$0xff]  ;;  %v1732_v63 = vld [vmem:[%s4033_s27 + $0x50] sm:$0xff] }
  0x27   : > { %3354 = vmatprep.mubr.msk.f32.mxu0 %vm459_vm0, %v4038_v31  ;;  %3563 = vmatpush3.bf16.msra.mxu0 %v3560_v26  ;;  %v1733_v0 = vld [vmem:[%s4033_s27 + $0x58] sm:$0xff]  ;;  %v1734_v1 = vld [vmem:[%s4033_s27 + $0x60] sm:$0xff]  ;;  %v1735_v2 = vld [vmem:[%s4033_s27 + $0x68] sm:$0xff] }
  0x28   : > { %3539 = vmatpush3.bf16.msra.mxu1 %v3536_v27  ;;  %1745 = vperm.xlu1 %3682, %v1723_v36   ;;  %v1736_v3 = vld [vmem:[%s4033_s27 + $0x70] sm:$0xff]  ;;  %v1737_v4 = vld [vmem:[%s4033_s27 + $0x78] sm:$0xff]  ;;  %v4379_v50 = vld [vmem:[%s5625_s3 + $0x8] sm:$0xff]  ;;  %s5288_s27 = scalar_lea.vmem [#allocation7], %s5250_s16 }
  0x29   : > { %3291 = vmatmul.mubr.msk.f32.gmra.mrb[4].mxu1 %vm459_vm0, %v4050_v34  ;;  %3549 = vmatprep.subr.bf16.mxu1 %v4042_v32  ;;  %v4386_v54 = vld [vmem:[%s5625_s3] sm:$0xff]  ;;  %vm4741_vm3 = vmpackc.low %vm1175_vm2, %vm1175_vm2  ;;  %s2795_s15 = sshll.u32 %s5288_s27, 4  ;;  %s5570_s15 = int_to_ptr.vmem [resolvable:$true] %s2795_s15 }
  0x2a   : > { %3355 = vmatmul.mubr.msk.f32.gmra.mrb[4].mxu0 %vm459_vm0, %v4050_v34  ;;  %3293 = vmatprep.mubr.msk.f32.mxu1 %vm459_vm0, %v4055_v35  ;;  %s3746_s12 = scalar_lea.vmem %s5570_s15, 8192 }
  0x2b   : > { %3357 = vmatprep.mubr.msk.f32.mxu0 %vm459_vm0, %v4055_v35  ;;  %p3747_p12 = scmp.ne.s32.totalorder %s5570_s15, %s3746_s12 }
  0x2c   : > { %1750 = vperm.xlu1 %3682, %v1724_v39  }
  0x2d   : > { %3294 = vmatmul.mubr.msk.f32.gmra.mrb[6].mxu1 %vm459_vm0, %v4066_v37  ;;  %p3748_p13 = pnand %p3747_p12, %p3924_p4 }
  0x2e   : > { %3358 = vmatmul.mubr.msk.f32.gmra.mrb[6].mxu0 %vm459_vm0, %v4066_v37  ;;  %3296 = vmatprep.mubr.msk.f32.mxu1 %vm459_vm0, %v4071_v38 }
  0x2f   : > { %3360 = vmatprep.mubr.msk.f32.mxu0 %vm459_vm0, %v4071_v38  ;;  %p3749_p0 = pneg %p3748_p13 }
  0x30   : > { %1755 = vperm.xlu1 %3682, %v1725_v42   ;;  %v4362_v42 = vld [vmem:[%s5630_s8] ss:$0 sm:$0xff] }
  0x31   : > { %3297 = vmatmul.mubr.msk.f32.gmra.mrb[8].mxu1 %vm459_vm0, %v4081_v40 }
  0x32   : > { %3361 = vmatmul.mubr.msk.f32.gmra.mrb[8].mxu0 %vm459_vm0, %v4081_v40  ;;  %3299 = vmatprep.mubr.msk.f32.mxu1 %vm459_vm0, %v4086_v41 }
  0x33   : > { %3363 = vmatprep.mubr.msk.f32.mxu0 %vm459_vm0, %v4086_v41 }
  0x34   : > { %1760 = vperm.xlu1 %3682, %v1726_v45  }
  0x35   : > { %3300 = vmatmul.mubr.msk.f32.gmra.mrb[10].mxu1 %vm459_vm0, %v4096_v43 }
  0x36   : > { %3364 = vmatmul.mubr.msk.f32.gmra.mrb[10].mxu0 %vm459_vm0, %v4096_v43  ;;  %3302 = vmatprep.mubr.msk.f32.mxu1 %vm459_vm0, %v4101_v44 }
  0x37   : > { %3366 = vmatprep.mubr.msk.f32.mxu0 %vm459_vm0, %v4101_v44 }
  0x38   : > { %1765 = vperm.xlu1 %3682, %v1727_v48   ;;  %v4374_v48 = vld [vmem:[%s5626_s4] sm:$0xff] }
  0x39   : > { %3303 = vmatmul.mubr.msk.f32.gmra.mrb[12].mxu1 %vm459_vm0, %v4111_v46 }
  0x3a   : > { %3367 = vmatmul.mubr.msk.f32.gmra.mrb[12].mxu0 %vm459_vm0, %v4111_v46  ;;  %3305 = vmatprep.mubr.msk.f32.mxu1 %vm459_vm0, %v4116_v47 }
  0x3b   : > { %3369 = vmatprep.mubr.msk.f32.mxu0 %vm459_vm0, %v4116_v47 }
  0x3c   : > { %1770 = vperm.xlu1 %3682, %v1728_v59  }
  0x3d   : > { %3306 = vmatmul.mubr.msk.f32.gmra.mrb[14].mxu1 %vm459_vm0, %v4126_v49 }
  0x3e   : > { %3370 = vmatmul.mubr.msk.f32.gmra.mrb[14].mxu0 %vm459_vm0, %v4126_v49  ;;  %3316 = vmatprep.mubr.msk.f32.mxu1 %vm459_vm0, %v3989_v18 }
  0x3f   : > { %3412 = vmatprep.mubr.msk.f32.mxu0 %vm459_vm0, %v3989_v18 }
  0x40   : > { %1775 = vperm.xlu1 %3682, %v1729_v60  }
  0x41   : > { %3317 = vmatmul.mubr.msk.f32.vlgmr.msra.gmra.mrb[16].mxu1 %vm459_vm0, %v4002_v22 }
  0x42   : > { %3413 = vmatmul.mubr.msk.f32.vlgmr.msra.gmra.mrb[16].mxu0 %vm459_vm0, %v4002_v22  ;;  %3319 = vmatprep.mubr.msk.f32.mxu1 %vm459_vm0, %v4011_v25 }
  0x43   : > { %3415 = vmatprep.mubr.msk.f32.mxu0 %vm459_vm0, %v4011_v25  ;;  %3551 = vmatpush3.bf16.msra.mxu1 %v4042_v32 }
  0x44   : > { %3553 = vmatprep.subr.bf16.mxu1 %v3552_v52  ;;  %1780 = vperm.xlu1 %3682, %v1730_v61  }
  0x45   : > { %3320 = vmatmul.mubr.msk.f32.gmra.mrb[18].mxu1 %vm459_vm0, %v4020_v28 }
  0x46   : > { %3322 = vmatprep.mubr.msk.f32.mxu1 %vm459_vm0, %v4038_v31  ;;  %3416 = vmatmul.mubr.msk.f32.gmra.mrb[18].mxu0 %vm459_vm0, %v4020_v28 }
  0x47   : > { %3555 = vmatpush3.bf16.msra.mxu1 %v3552_v52  ;;  %3418 = vmatprep.mubr.msk.f32.mxu0 %vm459_vm0, %v4038_v31 }
  0x48   : > { %3565 = vmatprep.subr.bf16.mxu1 %v3564_v55  ;;  %1785 = vperm.xlu1 %3682, %v1731_v62   ;;  %v4399_v62 = vld [vmem:[%s5626_s4 + $0x18] sm:$0xff] }
  0x49   : > { %3323 = vmatmul.mubr.msk.f32.gmra.mrb[20].mxu1 %vm459_vm0, %v4050_v34 }
  0x4a   : > { %3325 = vmatprep.mubr.msk.f32.mxu1 %vm459_vm0, %v4055_v35  ;;  %3419 = vmatmul.mubr.msk.f32.gmra.mrb[20].mxu0 %vm459_vm0, %v4050_v34 }
  0x4b   : > { %3421 = vmatprep.mubr.msk.f32.mxu0 %vm459_vm0, %v4055_v35 }
  0x4c   : > { %1790 = vperm.xlu1 %3682, %v1732_v63  }
  0x4d   : > { %3326 = vmatmul.mubr.msk.f32.gmra.mrb[22].mxu1 %vm459_vm0, %v4066_v37 }
  0x4e   : > { %3328 = vmatprep.mubr.msk.f32.mxu1 %vm459_vm0, %v4071_v38  ;;  %3422 = vmatmul.mubr.msk.f32.gmra.mrb[22].mxu0 %vm459_vm0, %v4066_v37 }
  0x4f   : > { %3424 = vmatprep.mubr.msk.f32.mxu0 %vm459_vm0, %v4071_v38 }
  0x50   : > { %1795 = vperm.xlu1 %3682, %v1733_v0  }
  0x51   : > { %3329 = vmatmul.mubr.msk.f32.gmra.mrb[24].mxu1 %vm459_vm0, %v4081_v40 }
  0x52   : > { %3331 = vmatprep.mubr.msk.f32.mxu1 %vm459_vm0, %v4086_v41  ;;  %3425 = vmatmul.mubr.msk.f32.gmra.mrb[24].mxu0 %vm459_vm0, %v4081_v40 }
  0x53   : > { %3427 = vmatprep.mubr.msk.f32.mxu0 %vm459_vm0, %v4086_v41 }
  0x54   : > { %1800 = vperm.xlu1 %3682, %v1734_v1  }
  0x55   : > { %3332 = vmatmul.mubr.msk.f32.gmra.mrb[26].mxu1 %vm459_vm0, %v4096_v43 }
  0x56   : > { %3334 = vmatprep.mubr.msk.f32.mxu1 %vm459_vm0, %v4101_v44  ;;  %3428 = vmatmul.mubr.msk.f32.gmra.mrb[26].mxu0 %vm459_vm0, %v4096_v43 }
  0x57   : > { %3430 = vmatprep.mubr.msk.f32.mxu0 %vm459_vm0, %v4101_v44 }
  0x58   : > { %1805 = vperm.xlu1 %3682, %v1735_v2   ;;  %v4406_v2 = vld [vmem:[%s5626_s4 + $0x10] sm:$0xff] }
  0x59   : > { %3335 = vmatmul.mubr.msk.f32.gmra.mrb[28].mxu1 %vm459_vm0, %v4111_v46 }
  0x5a   : > { %3337 = vmatprep.mubr.msk.f32.mxu1 %vm459_vm0, %v4116_v47  ;;  %3431 = vmatmul.mubr.msk.f32.gmra.mrb[28].mxu0 %vm459_vm0, %v4111_v46 }
  0x5b   : > { %3433 = vmatprep.mubr.msk.f32.mxu0 %vm459_vm0, %v4116_v47 }
  0x5c   : > { %1810 = vperm.xlu1 %3682, %v1736_v3  }
  0x5d   : > { %3338 = vmatmul.mubr.msk.f32.gmra.mrb[30].mxu1 %vm459_vm0, %v4126_v49 }
  0x5e   : > { %3380 = vmatprep.mubr.msk.f32.mxu1 %vm459_vm0, %v3989_v18  ;;  %3434 = vmatmul.mubr.msk.f32.gmra.mrb[30].mxu0 %vm459_vm0, %v4126_v49 }
  0x60   : > { %1815 = vperm.xlu1 %3682, %v1737_v4  }
  0x61   : > { %3381 = vmatmul.mubr.msk.f32.vlgmr.msra.gmra.mrb[32].mxu1 %vm459_vm0, %v4002_v22 }
  0x62   : > { %3383 = vmatprep.mubr.msk.f32.mxu1 %vm459_vm0, %v4011_v25  ;;  %3567 = vmatpush3.bf16.msra.mxu1 %v3564_v55 }
  0x63   : > { %3569 = vmatprep.subr.bf16.mxu1 %v3568_v58 }
  0x65   : > { %3384 = vmatmul.mubr.msk.f32.gmra.mrb[34].mxu1 %vm459_vm0, %v4020_v28 }
  0x66   : > { %3386 = vmatprep.mubr.msk.f32.mxu1 %vm459_vm0, %v4038_v31  ;;  %3571 = vmatpush3.bf16.msra.mxu1 %v3568_v58 }
  0x69   : > { %3387 = vmatmul.mubr.msk.f32.gmra.mrb[36].mxu1 %vm459_vm0, %v4050_v34 }
  0x6a   : > { %3389 = vmatprep.mubr.msk.f32.mxu1 %vm459_vm0, %v4055_v35 }
  0x6d   : > { %3390 = vmatmul.mubr.msk.f32.gmra.mrb[38].mxu1 %vm459_vm0, %v4066_v37 }
  0x6e   : > { %3392 = vmatprep.mubr.msk.f32.mxu1 %vm459_vm0, %v4071_v38 }
  0x71   : > { %3393 = vmatmul.mubr.msk.f32.gmra.mrb[40].mxu1 %vm459_vm0, %v4081_v40 }
  0x72   : > { %3395 = vmatprep.mubr.msk.f32.mxu1 %vm459_vm0, %v4086_v41 }
  0x75   : > { %3396 = vmatmul.mubr.msk.f32.gmra.mrb[42].mxu1 %vm459_vm0, %v4096_v43 }
  0x76   : > { %3398 = vmatprep.mubr.msk.f32.mxu1 %vm459_vm0, %v4101_v44 }
  0x79   : > { %3399 = vmatmul.mubr.msk.f32.gmra.mrb[44].mxu1 %vm459_vm0, %v4111_v46 }
  0x7a   : > { %3401 = vmatprep.mubr.msk.f32.mxu1 %vm459_vm0, %v4116_v47 }
  0x7d   : > { %3402 = vmatmul.mubr.msk.f32.gmra.mrb[46].mxu1 %vm459_vm0, %v4126_v49 }
  0x7e   : > { %3444 = vmatprep.mubr.msk.f32.mxu1 %vm459_vm0, %v3989_v18 }
  0x81   : > { %3445 = vmatmul.mubr.msk.f32.vlgmr.msra.gmra.mrb[48].mxu1 %vm459_vm0, %v4002_v22 }
  0x82   : > { %3447 = vmatprep.mubr.msk.f32.mxu1 %vm459_vm0, %v4011_v25 }
  0x85   : > { %3448 = vmatmul.mubr.msk.f32.gmra.mrb[50].mxu1 %vm459_vm0, %v4020_v28 }
  0x86   : > { %3450 = vmatprep.mubr.msk.f32.mxu1 %vm459_vm0, %v4038_v31 }
  0x89   : > { %3451 = vmatmul.mubr.msk.f32.gmra.mrb[52].mxu1 %vm459_vm0, %v4050_v34 }
  0x8a   : > { %3453 = vmatprep.mubr.msk.f32.mxu1 %vm459_vm0, %v4055_v35  ;;  %v4343_v35 = vld [vmem:[%s5628_s6] ss:$0 sm:$0xff] }
  0x8d   : > { %3454 = vmatmul.mubr.msk.f32.gmra.mrb[54].mxu1 %vm459_vm0, %v4066_v37 }
  0x8e   : > { %3456 = vmatprep.mubr.msk.f32.mxu1 %vm459_vm0, %v4071_v38 }
  0x91   : > { %3457 = vmatmul.mubr.msk.f32.gmra.mrb[56].mxu1 %vm459_vm0, %v4081_v40  ;;  %v4356_v40 = vld [vmem:[%s5628_s6 + $0x1] ss:$0 sm:$0xff] }
  0x92   : > { %3459 = vmatprep.mubr.msk.f32.mxu1 %vm459_vm0, %v4086_v41 }
  0x95   : > { %3460 = vmatmul.mubr.msk.f32.gmra.mrb[58].mxu1 %vm459_vm0, %v4096_v43 }
  0x96   : > { %3462 = vmatprep.mubr.msk.f32.mxu1 %vm459_vm0, %v4101_v44  ;;  %v4368_v44 = vld [vmem:[%s5626_s4 + $0x8] sm:$0xff] }
  0x99   : > { %3463 = vmatmul.mubr.msk.f32.gmra.mrb[60].mxu1 %vm459_vm0, %v4111_v46 }
  0x9a   : > { %3465 = vmatprep.mubr.msk.f32.mxu1 %vm459_vm0, %v4116_v47 }
  0x9d   : > { %3466 = vmatmul.mubr.msk.f32.gmra.mrb[62].mxu1 %vm459_vm0, %v4126_v49 }
  0xf4   : > { %v3286_v6 = vpop.f32.mrb[0].mxu1 }
  0xf5   : > { %v4292_v8 = vpop.f32.mrb[0].mxu0  ;;  %v574_v9 = vpop.f32.mrb[1].mxu1  ;;  %v580_v41 = vadd.f32 %v3286_v6, %v4343_v35  ;;  %v4411_v6 = vld [vmem:[%s5625_s3 + $0x18] sm:$0xff] }
  0xf6   : > { %v4294_v10 = vpop.f32.mrb[1].mxu0  ;;  %v575_v43 = vadd.f32 %v4343_v35, %v574_v9 }
  0xf7   : > { %v1128_v55 = vmul.f32 %v580_v41, %v4379_v50 }
  0xf8   : > { %v3289_v11 = vpop.f32.mrb[2].mxu1  ;;  %v1127_v59 = vmul.f32 %v575_v43, %v4386_v54  ;;  %v4418_v43 = vld [vmem:[%s5625_s3 + $0x10] sm:$0xff] }
  0xf9   : > { %v4296_v12 = vpop.f32.mrb[2].mxu0  ;;  %v584_v13 = vpop.f32.mrb[3].mxu1  ;;  %v590_v56 = vadd.f32 %v3289_v11, %v4343_v35 }
  0xfa   : > { %v4298_v14 = vpop.f32.mrb[3].mxu0  ;;  %v585_v60 = vadd.f32 %v4343_v35, %v584_v13 }
  0xfc   : > { %v4300_v15 = vpop.f32.mrb[4].mxu1 }
  0xfd   : > { %v4302_v16 = vpop.f32.mrb[4].mxu0  ;;  %v4304_v17 = vpop.f32.mrb[5].mxu1 }
  0xfe   : > { %v4306_v18 = vpop.f32.mrb[5].mxu0 }
 0x100   : > { %v4308_v19 = vpop.f32.mrb[6].mxu1 }
 0x101   : > { %v4310_v20 = vpop.f32.mrb[6].mxu0  ;;  %v4312_v21 = vpop.f32.mrb[7].mxu1 }
 0x102   : > { %v4314_v22 = vpop.f32.mrb[7].mxu0 }
 0x104   : > { %v4316_v23 = vpop.f32.mrb[8].mxu1 }
 0x105   : > { %v4318_v24 = vpop.f32.mrb[8].mxu0  ;;  %v4320_v25 = vpop.f32.mrb[9].mxu1 }
 0x106   : > { %v4322_v26 = vpop.f32.mrb[9].mxu0 }
 0x108   : > { %v4324_v27 = vpop.f32.mrb[10].mxu1 }
 0x109   : > { %v4326_v28 = vpop.f32.mrb[10].mxu0  ;;  %v4328_v29 = vpop.f32.mrb[11].mxu1 }
 0x10a   : > { %v4330_v30 = vpop.f32.mrb[11].mxu0 }
 0x10c   : > { %v4332_v31 = vpop.f32.mrb[12].mxu1 }
 0x10d   : > { %v4334_v32 = vpop.f32.mrb[12].mxu0  ;;  %v4336_v33 = vpop.f32.mrb[13].mxu1 }
 0x10e   : > { %v4338_v34 = vpop.f32.mrb[13].mxu0 }
 0x110   : > { %v4345_v36 = vpop.f32.mrb[14].mxu1 }
 0x111   : > { %v4347_v37 = vpop.f32.mrb[14].mxu0  ;;  %v4349_v38 = vpop.f32.mrb[15].mxu1 }
 0x112   : > { %5649 = vst [vmem:[#allocation10_spill] sm:$0xff] %v4347_v37  ;;  %v4351_v39 = vpop.f32.mrb[15].mxu0  ;;  %v5655_v37 = vmov 3  }
 0x113   : > { %5650 = vst [vmem:[#allocation11_spill] sm:$0xff] %v4351_v39  ;;  %v5654_v39 = vmov 2  }
 0x114   : > { %v3318_v45 = vpop.f32.mrb[16].mxu1 }
 0x115   : > { %v738_v46 = vadd.f32 %v3318_v45, %v4356_v40  ;;  %v3414_v47 = vpop.f32.mrb[16].mxu0  ;;  %v732_v49 = vpop.f32.mrb[17].mxu1  ;;  %v1130_v45 = vmul.f32 %v590_v56, %v4411_v6 }
 0x116   : > { %v1339_v51 = vadd.f32 %v3414_v47, %v4362_v42  ;;  %v733_v52 = vadd.f32 %v4356_v40, %v732_v49  ;;  %v1333_v53 = vpop.f32.mrb[17].mxu0 }
 0x117   : > { %v1144_v57 = vmul.f32 %v738_v46, %v4368_v44  ;;  %v1334_v58 = vadd.f32 %v4362_v42, %v1333_v53  ;;  %v600_v46 = vadd.f32 %v4300_v15, %v4343_v35 }
 0x118   : > { %1414 = vst.msk [vmem:[#allocation4 + $0x8] sm:$0xff] %vm1412_vm1, %v1339_v51  ;;  %v1143_v61 = vmul.f32 %v733_v52, %v4374_v48  ;;  %v3321_v63 = vpop.f32.mrb[18].mxu1  ;;  %v1129_v51 = vmul.f32 %v585_v60, %v4418_v43  ;;  %v595_v52 = vadd.f32 %v4343_v35, %v4304_v17  ;;  %v4447_v60 = vld [vmem:[%s5625_s3 + $0x28] sm:$0xff] }
 0x119   : > { %v1160_v0 = vadd.f32 %v1144_v57, %v1128_v55  ;;  %1413 = vst.msk [vmem:[#allocation4] sm:$0xff] %vm1412_vm1, %v1334_v58  ;;  %v748_v1 = vadd.f32 %v3321_v63, %v4356_v40  ;;  %v742_v3 = vpop.f32.mrb[19].mxu1  ;;  %v3417_v4 = vpop.f32.mrb[18].mxu0  ;;  %v4434_v55 = vld [vmem:[%s5626_s4 + $0x28] sm:$0xff]  ;;  %v4441_v58 = vld [vmem:[%s5626_s4 + $0x20] sm:$0xff] }
 0x11a   : > { %v1159_v9 = vadd.f32 %v1143_v61, %v1127_v59  ;;  %v743_v11 = vadd.f32 %v4356_v40, %v742_v3  ;;  %v1349_v13 = vadd.f32 %v3417_v4, %v4362_v42  ;;  %v1343_v41 = vpop.f32.mrb[19].mxu0  ;;  %v4454_v3 = vld [vmem:[%s5625_s3 + $0x20] sm:$0xff]  ;;  %v1132_v4 = vmul.f32 %v600_v46, %v4447_v60 }
 0x11b   : > { %1177 = vst.msk [vmem:[#allocation2 + $0x8] sm:$0xff] %vm1175_vm2, %v1160_v0  ;;  %v1146_v47 = vmul.f32 %v748_v1, %v4399_v62  ;;  %v1344_v49 = vadd.f32 %v4362_v42, %v1343_v41 }
 0x11c   : > { %1176 = vst.msk [vmem:[#allocation2] sm:$0xff] %vm1175_vm2, %v1159_v9  ;;  %v1145_v53 = vmul.f32 %v743_v11, %v4406_v2  ;;  %v3324_v15 = vpop.f32.mrb[20].mxu1  ;;  %v610_v9 = vadd.f32 %v4308_v19, %v4343_v35  ;;  %v4474_v19 = vld [vmem:[%s5626_s4 + $0x38] sm:$0xff] }
 0x11d   : > { %1416 = vst.msk [vmem:[#allocation4 + $0x18] sm:$0xff] %vm1412_vm1, %v1349_v13  ;;  %v1162_v56 = vadd.f32 %v1146_v47, %v1130_v45  ;;  %v758_v57 = vadd.f32 %v3324_v15, %v4356_v40  ;;  %v752_v17 = vpop.f32.mrb[21].mxu1  ;;  %1415 = vst.msk [vmem:[#allocation4 + $0x10] sm:$0xff] %vm1412_vm1, %v1344_v49  ;;  %v3420_v59 = vpop.f32.mrb[20].mxu0  ;;  %v1131_v45 = vmul.f32 %v595_v52, %v4454_v3 }
 0x11e   : > { %v1161_v61 = vadd.f32 %v1145_v53, %v1129_v51  ;;  %v753_v63 = vadd.f32 %v4356_v40, %v752_v17  ;;  %v1359_v0 = vadd.f32 %v3420_v59, %v4362_v42  ;;  %v1353_v1 = vpop.f32.mrb[21].mxu0  ;;  %v605_v47 = vadd.f32 %v4343_v35, %v4312_v21  ;;  %v4481_v21 = vld [vmem:[%s5626_s4 + $0x30] sm:$0xff] }
 0x11f   : > { %1179 = vst.msk [vmem:[#allocation2 + $0x18] sm:$0xff] %vm1175_vm2, %v1162_v56  ;;  %v1148_v11 = vmul.f32 %v758_v57, %v4434_v55  ;;  %v4461_v13 = vld [vmem:[#allocation4 + $0x8] sm:$0xff]  ;;  %v1354_v41 = vadd.f32 %v4362_v42, %v1353_v1  ;;  %v4487_v56 = vld [vmem:[%s5625_s3 + $0x38] sm:$0xff]  ;;  %v620_v1 = vadd.f32 %v4316_v23, %v4343_v35 }
 0x120   : > { %1178 = vst.msk [vmem:[#allocation2 + $0x10] sm:$0xff] %vm1175_vm2, %v1161_v61  ;;  %v1147_v46 = vmul.f32 %v753_v63, %v4441_v58  ;;  %2487 = vperm.xlu0 %3684, %v4461_v13   ;;  %2156 = vperm.xlu1 %3682, %v4461_v13   ;;  %v3327_v49 = vpop.f32.mrb[22].mxu1  ;;  %v4494_v63 = vld [vmem:[%s5625_s3 + $0x30] sm:$0xff]  ;;  %v4509_v23 = vld [vmem:[#allocation4] sm:$0xff] }
 0x121   : > { %1418 = vst.msk [vmem:[#allocation4 + $0x28] sm:$0xff] %vm1412_vm1, %v1359_v0  ;;  %v1164_v51 = vadd.f32 %v1148_v11, %v1132_v4  ;;  %v768_v52 = vadd.f32 %v3327_v49, %v4356_v40  ;;  %v762_v53 = vpop.f32.mrb[23].mxu1  ;;  %1417 = vst.msk [vmem:[#allocation4 + $0x20] sm:$0xff] %vm1412_vm1, %v1354_v41  ;;  %v3423_v15 = vpop.f32.mrb[22].mxu0  ;;  %v1134_v0 = vmul.f32 %v610_v9, %v4487_v56  ;;  %v5634_v9 = vmov 1  }
 0x122   : > { %v1163_v57 = vadd.f32 %v1147_v46, %v1131_v45  ;;  %v763_v17 = vadd.f32 %v4356_v40, %v762_v53  ;;  %v1369_v59 = vadd.f32 %v3423_v15, %v4362_v42  ;;  %v1363_v61 = vpop.f32.mrb[23].mxu0  ;;  %v1133_v45 = vmul.f32 %v605_v47, %v4494_v63  ;;  %v4523_v53 = vld [vmem:[%s5626_s4 + $0x40] sm:$0xff] }
 0x123   : > { %1181 = vst.msk [vmem:[#allocation2 + $0x28] sm:$0xff] %vm1175_vm2, %v1164_v51  ;;  %v1150_v4 = vmul.f32 %v768_v52, %v4474_v19  ;;  %v1622_v11 = vld [vmem:[#allocation2] sm:$0xff]  ;;  %v1364_v41 = vadd.f32 %v4362_v42, %v1363_v61  ;;  %v615_v46 = vadd.f32 %v4343_v35, %v4320_v25  ;;  %v4514_v51 = vld [vmem:[%s5626_s4 + $0x48] sm:$0xff] }
 0x124   : > { %1180 = vst.msk [vmem:[#allocation2 + $0x20] sm:$0xff] %vm1175_vm2, %v1163_v57  ;;  %v1149_v49 = vmul.f32 %v763_v17, %v4481_v21  ;;  %3686 = vset.pattern.permute.xlu0 %v5632_v7  ;;  %3683 = vset.pattern.permute.xlu1 %v5634_v9  ;;  %v3330_v47 = vpop.f32.mrb[24].mxu1  ;;  %v4529_v17 = vld [vmem:[%s5625_s3 + $0x48] sm:$0xff]  ;;  %v630_v7 = vadd.f32 %v4324_v27, %v4343_v35 }
 0x125   : > { %1420 = vst.msk [vmem:[#allocation4 + $0x38] sm:$0xff] %vm1412_vm1, %v1369_v59  ;;  %v1166_v25 = vadd.f32 %v1150_v4, %v1134_v0  ;;  %2321 = vperm.xlu1 %3683, %v4461_v13   ;;  %2151 = vperm.xlu0 %3686, %v4509_v23   ;;  %v778_v52 = vadd.f32 %v3330_v47, %v4356_v40  ;;  %v772_v15 = vpop.f32.mrb[25].mxu1  ;;  %1419 = vst.msk [vmem:[#allocation4 + $0x30] sm:$0xff] %vm1412_vm1, %v1364_v41  ;;  %v3426_v57 = vpop.f32.mrb[24].mxu0  ;;  %v4537_v47 = vld [vmem:[%s5625_s3 + $0x40] sm:$0xff] }
 0x126   : > { %v1165_v59 = vadd.f32 %v1149_v49, %v1133_v45  ;;  %3500 = vmatprep.mubr.msk.f32.mxu0 %vm1175_vm2, %v1622_v11  ;;  %v773_v61 = vadd.f32 %v4356_v40, %v772_v15  ;;  %v1379_v0 = vadd.f32 %v3426_v57, %v4362_v42  ;;  %v1373_v4 = vpop.f32.mrb[25].mxu0  ;;  %v1136_v41 = vmul.f32 %v620_v1, %v4529_v17  ;;  %v4553_v1 = vld [vmem:[%s5626_s4 + $0x58] sm:$0xff] }
 0x127   : > { %1183 = vst.msk [vmem:[#allocation2 + $0x38] sm:$0xff] %vm1175_vm2, %v1166_v25  ;;  %v1152_v45 = vmul.f32 %v778_v52, %v4514_v51  ;;  %v1374_v11 = vadd.f32 %v4362_v42, %v1373_v4  ;;  %v1135_v49 = vmul.f32 %v615_v46, %v4537_v47  ;;  %v625_v15 = vadd.f32 %v4343_v35, %v4328_v29 }
 0x128   : > { %1182 = vst.msk [vmem:[#allocation2 + $0x30] sm:$0xff] %vm1175_vm2, %v1165_v59  ;;  %v1151_v57 = vmul.f32 %v773_v61, %v4523_v53  ;;  %v3333_v27 = vpop.f32.mrb[26].mxu1  ;;  %v640_v25 = vadd.f32 %v4332_v31, %v4343_v35  ;;  %v5636_v46 = vmov 3   ;;  %v4564_v59 = vld [vmem:[%s5626_s4 + $0x50] sm:$0xff]  ;;  %v4570_v31 = vld [vmem:[%s5625_s3 + $0x58] sm:$0xff] }
 0x129   : > { %1422 = vst.msk [vmem:[#allocation4 + $0x48] sm:$0xff] %vm1412_vm1, %v1379_v0  ;;  %v1168_v52 = vadd.f32 %v1152_v45, %v1136_v41  ;;  %3685 = vset.pattern.permute.xlu1 %v5636_v46  ;;  %3687 = vset.pattern.permute.xlu0 %v5634_v9  ;;  %v788_v29 = vadd.f32 %v3333_v27, %v4356_v40  ;;  %v782_v61 = vpop.f32.mrb[27].mxu1  ;;  %1421 = vst.msk [vmem:[#allocation4 + $0x40] sm:$0xff] %vm1412_vm1, %v1374_v11  ;;  %v3429_v0 = vpop.f32.mrb[26].mxu0  ;;  %v4579_v11 = vld [vmem:[%s5625_s3 + $0x50] sm:$0xff] }
 0x12a   : > { %v1167_v4 = vadd.f32 %v1151_v57, %v1135_v49  ;;  %2653 = vperm.xlu1 %3685, %v4461_v13   ;;  %2316 = vperm.xlu0 %3687, %v4509_v23   ;;  %v783_v41 = vadd.f32 %v4356_v40, %v782_v61  ;;  %v1389_v45 = vadd.f32 %v3429_v0, %v4362_v42  ;;  %v1383_v27 = vpop.f32.mrb[27].mxu0  ;;  %v4588_v57 = vld [vmem:[%s5625_s3 + $0x68] sm:$0xff] }
 0x12b   : > { %v1138_v9 = vmul.f32 %v630_v7, %v4570_v31  ;;  %1185 = vst.msk [vmem:[#allocation2 + $0x48] sm:$0xff] %vm1175_vm2, %v1168_v52  ;;  %v1154_v49 = vmul.f32 %v788_v29, %v4553_v1  ;;  %v1384_v13 = vadd.f32 %v4362_v42, %v1383_v27  ;;  %5651 = vst [vmem:[#allocation12_spill] sm:$0xff] %v4588_v57  ;;  %v4598_v52 = vld [vmem:[%s5626_s4 + $0x68] sm:$0xff] }
 0x12c   : > { %v1137_v61 = vmul.f32 %v625_v15, %v4579_v11  ;;  %v635_v0 = vadd.f32 %v4343_v35, %v4336_v33  ;;  %1184 = vst.msk [vmem:[#allocation2 + $0x40] sm:$0xff] %vm1175_vm2, %v1167_v4  ;;  %v1153_v7 = vmul.f32 %v783_v41, %v4564_v59  ;;  %5652 = vst [vmem:[#allocation13_spill] sm:$0xff] %v4598_v52  ;;  %v3336_v29 = vpop.f32.mrb[28].mxu1  ;;  %v4606_v33 = vld [vmem:[%s5626_s4 + $0x60] sm:$0xff] }
 0x12d   : > { %1424 = vst.msk [vmem:[#allocation4 + $0x58] sm:$0xff] %vm1412_vm1, %v1389_v45  ;;  %v1140_v27 = vmul.f32 %v640_v25, %v4588_v57  ;;  %v1170_v46 = vadd.f32 %v1154_v49, %v1138_v9  ;;  %v798_v15 = vadd.f32 %v3336_v29, %v4356_v40  ;;  %5653 = vst [vmem:[#allocation14_spill] sm:$0xff] %v4606_v33  ;;  %v792_v4 = vpop.f32.mrb[29].mxu1  ;;  %v3432_v41 = vpop.f32.mrb[28].mxu0  ;;  %v4616_v49 = vld [vmem:[%s5628_s6 + $0x2] ss:$0 sm:$0xff] }
 0x12e   : > { %1423 = vst.msk [vmem:[#allocation4 + $0x50] sm:$0xff] %vm1412_vm1, %v1384_v13  ;;  %v1169_v5 = vadd.f32 %v1153_v7, %v1137_v61  ;;  %3688 = vset.pattern.permute.xlu1 %v5654_v39  ;;  %3689 = vset.pattern.permute.xlu0 %v5655_v37  ;;  %v793_v45 = vadd.f32 %v4356_v40, %v792_v4  ;;  %v1393_v25 = vpop.f32.mrb[29].mxu0  ;;  %v4621_v13 = vld [vmem:[%s5625_s3 + $0x60] sm:$0xff] }
 0x12f   : > { %v1399_v9 = vadd.f32 %v3432_v41, %v4362_v42  ;;  %5656 = vst [vmem:[#allocation15_spill] sm:$0xff] %v4621_v13  ;;  %v650_v61 = vadd.f32 %v4345_v36, %v4343_v35  ;;  %1187 = vst.msk [vmem:[#allocation2 + $0x58] sm:$0xff] %vm1175_vm2, %v1170_v46  ;;  %v1156_v7 = vmul.f32 %v798_v15, %v4598_v52  ;;  %2482 = vperm.xlu1 %3688, %v4509_v23   ;;  %v4638_v36 = vld [vmem:[%s5626_s4 + $0x78] sm:$0xff] }
 0x130   : > { %2648 = vperm.xlu0 %3689, %v4509_v23   ;;  %v1394_v29 = vadd.f32 %v4362_v42, %v1393_v25  ;;  %v1139_v4 = vmul.f32 %v635_v0, %v4621_v13  ;;  %v645_v41 = vadd.f32 %v4343_v35, %v4349_v38  ;;  %1186 = vst.msk [vmem:[#allocation2 + $0x50] sm:$0xff] %vm1175_vm2, %v1169_v5  ;;  %5657 = vst [vmem:[#allocation16_spill] sm:$0xff] %v4638_v36  ;;  %v3339_v46 = vpop.f32.mrb[30].mxu1  ;;  %v4645_v0 = vld [vmem:[%s5626_s4 + $0x70] sm:$0xff]  ;;  %v2119_v5 = vld [vmem:[#allocation4 + $0x18] sm:$0xff] }
 0x131   : > { %v1155_v57 = vmul.f32 %v793_v45, %v4606_v33  ;;  %1426 = vst.msk [vmem:[#allocation4 + $0x68] sm:$0xff] %vm1412_vm1, %v1399_v9  ;;  %v1172_v23 = vadd.f32 %v1156_v7, %v1140_v27  ;;  %v808_v15 = vadd.f32 %v3339_v46, %v4356_v40  ;;  %v802_v35 = vpop.f32.mrb[31].mxu1  ;;  %v3435_v38 = vpop.f32.mrb[30].mxu0  ;;  %v896_v45 = vadd.f32 %v4292_v8, %v4616_v49  ;;  %v4653_v9 = vld [vmem:[%s5625_s3 + $0x78] sm:$0xff]  ;;  %v4659_v7 = vld [vmem:[%s5628_s6 + $0x3] ss:$0 sm:$0xff] }
 0x132   : > { %1425 = vst.msk [vmem:[#allocation4 + $0x60] sm:$0xff] %vm1412_vm1, %v1394_v29  ;;  %v803_v25 = vadd.f32 %v4356_v40, %v802_v35  ;;  %v1409_v46 = vadd.f32 %v3435_v38, %v4362_v42  ;;  %v1403_v29 = vpop.f32.mrb[31].mxu0  ;;  %v4665_v8 = vld [vmem:[%s5625_s3 + $0x70] sm:$0xff]  ;;  %v1142_v33 = vmul.f32 %v650_v61, %v4653_v9  ;;  %v5658_v40 = vmov 0  }
 0x133   : > { %v1171_v27 = vadd.f32 %v1155_v57, %v1139_v4  ;;  %1189 = vst.msk [vmem:[#allocation2 + $0x68] sm:$0xff] %vm1175_vm2, %v1172_v23  ;;  %v1158_v57 = vmul.f32 %v808_v15, %v4638_v36  ;;  %3690 = vset.pattern.permute.xlu1 %v5658_v40  ;;  %v5659_v4 = vmov 1   ;;  %v1404_v35 = vadd.f32 %v4362_v42, %v1403_v29  ;;  %v4701_v29 = vld [vmem:[#allocation4 + $0x28] sm:$0xff] }
 0x134   : > { %3691 = vset.pattern.permute.xlu0 %v5659_v4  ;;  %v891_v38 = vadd.f32 %v4616_v49, %v4294_v10  ;;  %v1141_v13 = vmul.f32 %v645_v41, %v4665_v8  ;;  %v1157_v52 = vmul.f32 %v803_v25, %v4645_v0  ;;  %2166 = vperm.xlu1 %3690, %v2119_v5   ;;  %v3382_v61 = vpop.f32.mrb[32].mxu1 }
 0x135   : > { %1188 = vst.msk [vmem:[#allocation2 + $0x60] sm:$0xff] %vm1175_vm2, %v1171_v27  ;;  %2331 = vperm.xlu0 %3691, %v2119_v5   ;;  %v1174_v23 = vadd.f32 %v1158_v57, %v1142_v33  ;;  %v1054_v15 = vadd.f32 %v3382_v61, %v4659_v7  ;;  %v1048_v36 = vpop.f32.mrb[33].mxu1  ;;  %v1193_v41 = vmul.f32 %v896_v45, %v4379_v50 }
 0x136   : > { %1428 = vst.msk [vmem:[#allocation4 + $0x78] sm:$0xff] %vm1412_vm1, %v1409_v46  ;;  %1427 = vst.msk [vmem:[#allocation4 + $0x70] sm:$0xff] %vm1412_vm1, %v1404_v35  ;;  %v1173_v42 = vadd.f32 %v1157_v52, %v1141_v13  ;;  %v1049_v10 = vadd.f32 %v4659_v7, %v1048_v36  ;;  %v906_v27 = vadd.f32 %v4296_v12, %v4616_v49 }
 0x137   : > { %1191 = vst.msk [vmem:[#allocation2 + $0x78] sm:$0xff] %vm1175_vm2, %v1174_v23  ;;  %v1209_v25 = vmul.f32 %v1054_v15, %v4368_v44  ;;  %v1192_v46 = vmul.f32 %v891_v38, %v4386_v54  ;;  %v901_v33 = vadd.f32 %v4616_v49, %v4298_v14  ;;  %v916_v45 = vadd.f32 %v4302_v16, %v4616_v49 }
 0x138   : > { %1190 = vst.msk [vmem:[#allocation2 + $0x70] sm:$0xff] %vm1175_vm2, %v1173_v42  ;;  %v1208_v52 = vmul.f32 %v1049_v10, %v4374_v48  ;;  %3692 = vset.pattern.permute.xlu1 %v5654_v39  ;;  %v3385_v50 = vpop.f32.mrb[34].mxu1  ;;  %v1195_v14 = vmul.f32 %v906_v27, %v4411_v6  ;;  %v921_v10 = vadd.f32 %v4616_v49, %v4314_v22 }
 0x139   : > { %3693 = vset.pattern.permute.xlu0 %v5655_v37  ;;  %v1225_v13 = vadd.f32 %v1209_v25, %v1193_v41  ;;  %2497 = vperm.xlu1 %3692, %v2119_v5   ;;  %v1064_v12 = vadd.f32 %v3385_v50, %v4659_v7  ;;  %v1058_v44 = vpop.f32.mrb[35].mxu1  ;;  %v1194_v57 = vmul.f32 %v901_v33, %v4418_v43  ;;  %v1624_v50 = vld [vmem:[#allocation2 + $0x10] sm:$0xff] }
 0x13a   : > { %2663 = vperm.xlu0 %3693, %v2119_v5   ;;  %v1224_v36 = vadd.f32 %v1208_v52, %v1192_v46  ;;  %v1059_v54 = vadd.f32 %v4659_v7, %v1058_v44  ;;  %v911_v5 = vadd.f32 %v4616_v49, %v4306_v18  ;;  %v926_v43 = vadd.f32 %v4310_v20, %v4616_v49 }
 0x13b   : > { %1241 = vst.msk [vmem:[#allocation3 + $0x8] sm:$0xff] %vm1175_vm2, %v1225_v13  ;;  %v1211_v48 = vmul.f32 %v1064_v12, %v4399_v62  ;;  %v4711_v62 = vld [vmem:[#allocation4 + $0x10] sm:$0xff]  ;;  %v936_v20 = vadd.f32 %v4318_v24, %v4616_v49 }
 0x13c   : > { %1240 = vst.msk [vmem:[#allocation3] sm:$0xff] %vm1175_vm2, %v1224_v36  ;;  %v1210_v35 = vmul.f32 %v1059_v54, %v4406_v2  ;;  %v3388_v38 = vpop.f32.mrb[36].mxu1  ;;  %v1197_v2 = vmul.f32 %v916_v45, %v4447_v60  ;;  %v1196_v42 = vmul.f32 %v911_v5, %v4454_v3  ;;  %v1199_v3 = vmul.f32 %v926_v43, %v4487_v56 }
 0x13d   : > { %v1227_v6 = vadd.f32 %v1211_v48, %v1195_v14  ;;  %3694 = vset.pattern.permute.xlu1 %v5658_v40  ;;  %v1074_v16 = vadd.f32 %v3388_v38, %v4659_v7  ;;  %v1068_v61 = vpop.f32.mrb[37].mxu1  ;;  %v1198_v56 = vmul.f32 %v921_v10, %v4494_v63  ;;  %v1201_v54 = vmul.f32 %v936_v20, %v4529_v17  ;;  %v4760_v17 = vld [vmem:[#allocation4 + $0x20] sm:$0xff] }
 0x13e   : > { %3699 = vset.pattern.permute.xlu0 %v5659_v4  ;;  %v1226_v23 = vadd.f32 %v1210_v35, %v1194_v57  ;;  %2161 = vperm.xlu1 %3694, %v4711_v62   ;;  %v1069_v18 = vadd.f32 %v4659_v7, %v1068_v61  ;;  %v941_v35 = vadd.f32 %v4616_v49, %v4330_v30  ;;  %v5664_v20 = vld [vmem:[#allocation13_spill] sm:$0xff] }
 0x13f   : > { %2341 = vperm.xlu0 %3699, %v4701_v29   ;;  %1243 = vst.msk [vmem:[#allocation3 + $0x18] sm:$0xff] %vm1175_vm2, %v1227_v6  ;;  %v1213_v15 = vmul.f32 %v1074_v16, %v4434_v55 }
 0x140   : > { %1242 = vst.msk [vmem:[#allocation3 + $0x10] sm:$0xff] %vm1175_vm2, %v1226_v23  ;;  %v1212_v41 = vmul.f32 %v1069_v18, %v4441_v58  ;;  %v3391_v27 = vpop.f32.mrb[38].mxu1  ;;  %v931_v58 = vadd.f32 %v4616_v49, %v4322_v26  ;;  %v956_v18 = vadd.f32 %v4334_v32, %v4616_v49  ;;  %v1202_v43 = vmul.f32 %v941_v35, %v4579_v11  ;;  %v4827_v35 = vld [vmem:[#allocation4 + $0x30] sm:$0xff] }
 0x141   : > { %v1229_v25 = vadd.f32 %v1213_v15, %v1197_v2  ;;  %v1084_v60 = vadd.f32 %v3391_v27, %v4659_v7  ;;  %v1078_v46 = vpop.f32.mrb[39].mxu1  ;;  %v951_v15 = vadd.f32 %v4616_v49, %v4338_v34 }
 0x142   : > { %v1228_v33 = vadd.f32 %v1212_v41, %v1196_v42  ;;  %3695 = vset.pattern.permute.xlu1 %v5659_v4  ;;  %v1079_v55 = vadd.f32 %v4659_v7, %v1078_v46  ;;  %v1639_v22 = vld [vmem:[#allocation3 + $0x8] sm:$0xff]  ;;  %v1200_v63 = vmul.f32 %v931_v58, %v4537_v47 }
 0x143   : > { %3701 = vset.pattern.permute.xlu0 %v5655_v37  ;;  %1245 = vst.msk [vmem:[#allocation3 + $0x28] sm:$0xff] %vm1175_vm2, %v1229_v25  ;;  %v1215_v52 = vmul.f32 %v1084_v60, %v4474_v19  ;;  %2326 = vperm.xlu1 %3695, %v4711_v62   ;;  %v1638_v24 = vld [vmem:[#allocation3] sm:$0xff]  ;;  %v5662_v25 = vld [vmem:[#allocation12_spill] sm:$0xff] }
 0x144   : > { %2673 = vperm.xlu0 %3701, %v4701_v29   ;;  %1244 = vst.msk [vmem:[#allocation3 + $0x20] sm:$0xff] %vm1175_vm2, %v1228_v33  ;;  %v1214_v26 = vmul.f32 %v1079_v55, %v4481_v21  ;;  %v3394_v13 = vpop.f32.mrb[40].mxu1  ;;  %v3572_v12 = vpack.c.bf16 %v1639_v22, %v1638_v24  ;;  %v946_v21 = vadd.f32 %v4326_v28, %v4616_v49  ;;  %v5663_v60 = vld [vmem:[#allocation10_spill] sm:$0xff]  ;;  %v5666_v22 = vld [vmem:[#allocation11_spill] sm:$0xff] }
 0x145   : > { %v1231_v19 = vadd.f32 %v1215_v52, %v1199_v3  ;;  %v1094_v44 = vadd.f32 %v3394_v13, %v4659_v7  ;;  %v1088_v36 = vpop.f32.mrb[41].mxu1  ;;  %v966_v46 = vadd.f32 %v5663_v60, %v4616_v49  ;;  %v961_v3 = vadd.f32 %v4616_v49, %v5666_v22  ;;  %v5667_v58 = vld [vmem:[#allocation14_spill] sm:$0xff] }
 0x146   : > { %v1230_v14 = vadd.f32 %v1214_v26, %v1198_v56  ;;  %v1089_v45 = vadd.f32 %v4659_v7, %v1088_v36  ;;  %3574 = vmatprep.subr.msk.bf16.mxu0 %vm4741_vm3, %v3572_v12  ;;  %v1641_v48 = vld [vmem:[#allocation3 + $0x18] sm:$0xff]  ;;  %v1203_v23 = vmul.f32 %v946_v21, %v4570_v31 }
 0x147   : > { %1247 = vst.msk [vmem:[#allocation3 + $0x38] sm:$0xff] %vm1175_vm2, %v1231_v19  ;;  %v1217_v57 = vmul.f32 %v1094_v44, %v4514_v51  ;;  %3696 = vset.pattern.permute.xlu1 %v5654_v39  ;;  %v1640_v5 = vld [vmem:[#allocation3 + $0x10] sm:$0xff]  ;;  %3577 = vmatpush3.bf16.xpose.msk.msra.mxu0 %vm4741_vm3, %v3572_v12  ;;  %v4806_v19 = vpop.permute.xlu1 %1740  ;;  %v1207_v36 = vmul.f32 %v966_v46, %v4653_v9 }
 0x148   : > { %3704 = vset.pattern.permute.xlu0 %v5654_v39  ;;  %1246 = vst.msk [vmem:[#allocation3 + $0x30] sm:$0xff] %vm1175_vm2, %v1230_v14  ;;  %v1216_v47 = vmul.f32 %v1089_v45, %v4523_v53  ;;  %2492 = vperm.xlu1 %3696, %v4711_v62   ;;  %v3397_v28 = vpop.f32.mrb[42].mxu1  ;;  %v3578_v51 = vpack.c.bf16 %v1641_v48, %v1640_v5  ;;  %v4774_v53 = vld [vmem:[#allocation4 + $0x38] sm:$0xff] }
 0x149   : > { %2502 = vperm.xlu0 %3704, %v4760_v17   ;;  %v1233_v38 = vadd.f32 %v1217_v57, %v1201_v54  ;;  %v1104_v6 = vadd.f32 %v3397_v28, %v4659_v7  ;;  %v1098_v16 = vpop.f32.mrb[43].mxu1  ;;  %v5668_v54 = vld [vmem:[#allocation16_spill] sm:$0xff]  ;;  %v1206_v45 = vmul.f32 %v961_v3, %v4665_v8 }
 0x14a   : > { %v1232_v61 = vadd.f32 %v1216_v47, %v1200_v63  ;;  %v1099_v30 = vadd.f32 %v4659_v7, %v1098_v16  ;;  %3580 = vmatprep.subr.msk.bf16.mxu0 %vm4741_vm3, %v3578_v51  ;;  %v1643_v41 = vld [vmem:[#allocation3 + $0x28] sm:$0xff] }
 0x14b   : > { %1249 = vst.msk [vmem:[#allocation3 + $0x48] sm:$0xff] %vm1175_vm2, %v1233_v38  ;;  %v1219_v2 = vmul.f32 %v1104_v6, %v4553_v1  ;;  %v1642_v11 = vld [vmem:[#allocation3 + $0x20] sm:$0xff]  ;;  %v4829_v8 = vpop.permute.xlu1 %1745 }
 0x14c   : > { %1248 = vst.msk [vmem:[#allocation3 + $0x40] sm:$0xff] %vm1175_vm2, %v1232_v61  ;;  %v1218_v42 = vmul.f32 %v1099_v30, %v4564_v59  ;;  %3697 = vset.pattern.permute.xlu1 %v5655_v37  ;;  %v3400_v31 = vpop.f32.mrb[44].mxu1  ;;  %v1205_v59 = vmul.f32 %v956_v18, %v5662_v25  ;;  %v3584_v56 = vpack.c.bf16 %v1643_v41, %v1642_v11 }
 0x14d   : > { %3707 = vset.pattern.permute.xlu0 %v5659_v4  ;;  %v1235_v10 = vadd.f32 %v1219_v2, %v1203_v23  ;;  %2658 = vperm.xlu1 %3697, %v4711_v62   ;;  %v1114_v32 = vadd.f32 %v3400_v31, %v4659_v7  ;;  %v1108_v1 = vpop.f32.mrb[45].mxu1  ;;  %v5665_v62 = vld [vmem:[#allocation15_spill] sm:$0xff] }
 0x14e   : > { %2351 = vperm.xlu0 %3707, %v4774_v53   ;;  %v1234_v34 = vadd.f32 %v1218_v42, %v1202_v43  ;;  %v1109_v27 = vadd.f32 %v4659_v7, %v1108_v1  ;;  %v1204_v55 = vmul.f32 %v951_v15, %v5665_v62  ;;  %v1645_v57 = vld [vmem:[#allocation3 + $0x38] sm:$0xff] }
 0x14f   : > { %1251 = vst.msk [vmem:[#allocation3 + $0x58] sm:$0xff] %vm1175_vm2, %v1235_v10  ;;  %v1221_v33 = vmul.f32 %v1114_v32, %v5664_v20  ;;  %3583 = vmatpush3.bf16.xpose.msk.msra.mxu0 %vm4741_vm3, %v3578_v51  ;;  %v4842_v51 = vld [vmem:[#allocation4 + $0x48] sm:$0xff]  ;;  %v4850_v38 = vpop.permute.xlu1 %1750  ;;  %v4875_v10 = vld [vmem:[#allocation4 + $0x40] sm:$0xff] }
 0x150   : > { %1250 = vst.msk [vmem:[#allocation3 + $0x50] sm:$0xff] %vm1175_vm2, %v1234_v34  ;;  %v1220_v52 = vmul.f32 %v1109_v27, %v5667_v58  ;;  %v3403_v24 = vpop.f32.mrb[46].mxu1  ;;  %3586 = vmatprep.subr.msk.bf16.mxu0 %vm4741_vm3, %v3584_v56  ;;  %v4886_v34 = vld [vmem:[#allocation4 + $0x58] sm:$0xff]  ;;  %v4920_v58 = vld [vmem:[#allocation4 + $0x68] sm:$0xff] }
 0x151   : > { %v1237_v26 = vadd.f32 %v1221_v33, %v1205_v59  ;;  %3698 = vset.pattern.permute.xlu1 %v5658_v40  ;;  %v1124_v13 = vadd.f32 %v3403_v24, %v4659_v7  ;;  %v1118_v12 = vpop.f32.mrb[47].mxu1 }
 0x152   : > { %v1236_v44 = vadd.f32 %v1220_v52, %v1204_v55  ;;  %3709 = vset.pattern.permute.xlu0 %v5655_v37  ;;  %v1119_v49 = vadd.f32 %v4659_v7, %v1118_v12  ;;  %2176 = vperm.xlu1 %3698, %v4701_v29   ;;  %v1644_v7 = vld [vmem:[#allocation3 + $0x30] sm:$0xff]  ;;  %v1647_v61 = vld [vmem:[#allocation3 + $0x48] sm:$0xff]  ;;  %v1625_v12 = vld [vmem:[#allocation2 + $0x18] sm:$0xff] }
 0x153   : > { %1253 = vst.msk [vmem:[#allocation3 + $0x68] sm:$0xff] %vm1175_vm2, %v1237_v26  ;;  %v1223_v14 = vmul.f32 %v1124_v13, %v5668_v54  ;;  %2683 = vperm.xlu0 %3709, %v4774_v53   ;;  %v1646_v16 = vld [vmem:[#allocation3 + $0x40] sm:$0xff]  ;;  %v4866_v2 = vpop.permute.xlu1 %1755  ;;  %v1623_v13 = vld [vmem:[#allocation2 + $0x8] sm:$0xff] }
 0x154   : > { %1252 = vst.msk [vmem:[#allocation3 + $0x60] sm:$0xff] %vm1175_vm2, %v1236_v44  ;;  %v1222_v48 = vmul.f32 %v1119_v49, %v4645_v0  ;;  %v4820_v63 = vpop.f32.mrb[48].mxu1  ;;  %v3590_v0 = vpack.c.bf16 %v1645_v57, %v1644_v7  ;;  %v3596_v23 = vpack.c.bf16 %v1647_v61, %v1646_v16  ;;  %v1626_v49 = vld [vmem:[#allocation2 + $0x20] sm:$0xff]  ;;  %v1627_v54 = vld [vmem:[#allocation2 + $0x28] sm:$0xff] }
 0x155   : > { %v1239_v21 = vadd.f32 %v1223_v14, %v1207_v36  ;;  %v4822_v9 = vpop.f32.mrb[49].mxu1  ;;  %v4958_v36 = vld [vmem:[#allocation4 + $0x78] sm:$0xff]  ;;  %v1628_v14 = vld [vmem:[#allocation2 + $0x30] sm:$0xff]  ;;  %v1630_v7 = vld [vmem:[#allocation2 + $0x40] sm:$0xff] }
 0x156   : > { %v1238_v5 = vadd.f32 %v1222_v48, %v1206_v45  ;;  %3700 = vset.pattern.permute.xlu1 %v5654_v39  ;;  %v1649_v31 = vld [vmem:[#allocation3 + $0x58] sm:$0xff]  ;;  %v4971_v48 = vld [vmem:[#allocation4 + $0x70] sm:$0xff]  ;;  %v1635_v61 = vld [vmem:[#allocation2 + $0x68] sm:$0xff] }
 0x157   : > { %1255 = vst.msk [vmem:[#allocation3 + $0x78] sm:$0xff] %vm1175_vm2, %v1239_v21  ;;  %3712 = vset.pattern.permute.xlu0 %v5654_v39  ;;  %2507 = vperm.xlu1 %3700, %v4701_v29   ;;  %v1648_v42 = vld [vmem:[#allocation3 + $0x50] sm:$0xff]  ;;  %v4880_v11 = vpop.permute.xlu1 %1760  ;;  %v1629_v21 = vld [vmem:[#allocation2 + $0x38] sm:$0xff] }
 0x158   : > { %1254 = vst.msk [vmem:[#allocation3 + $0x70] sm:$0xff] %vm1175_vm2, %v1238_v5  ;;  %2512 = vperm.xlu0 %3712, %v4827_v35   ;;  %v4834_v47 = vpop.f32.mrb[50].mxu1  ;;  %3589 = vmatpush3.bf16.xpose.msk.msra.mxu0 %vm4741_vm3, %v3584_v56  ;;  %v3602_v1 = vpack.c.bf16 %v1649_v31, %v1648_v42  ;;  %v4942_v56 = vld [vmem:[#allocation4 + $0x60] sm:$0xff]  ;;  %v1631_v5 = vld [vmem:[#allocation2 + $0x48] sm:$0xff] }
 0x159   : > { %v4838_v28 = vpop.f32.mrb[51].mxu1  ;;  %3592 = vmatprep.subr.msk.bf16.mxu0 %vm4741_vm3, %v3590_v0 }
 0x15a   : > { %v1651_v59 = vld [vmem:[#allocation3 + $0x68] sm:$0xff] }
 0x15b   : > { %3702 = vset.pattern.permute.xlu1 %v5658_v40  ;;  %v1650_v25 = vld [vmem:[#allocation3 + $0x60] sm:$0xff]  ;;  %v4898_v60 = vpop.permute.xlu1 %1765 }
 0x15c   : > { %3715 = vset.pattern.permute.xlu0 %v5659_v4  ;;  %v4846_v29 = vpop.f32.mrb[52].mxu1  ;;  %2171 = vperm.xlu1 %3702, %v4760_v17   ;;  %v3608_v20 = vpack.c.bf16 %v1651_v59, %v1650_v25 }
 0x15d   : > { %2361 = vperm.xlu0 %3715, %v4842_v51   ;;  %v4852_v6 = vpop.f32.mrb[53].mxu1 }
 0x15e   : > { %v1653_v22 = vld [vmem:[#allocation3 + $0x78] sm:$0xff] }
 0x15f   : > { %v4913_v62 = vpop.permute.xlu1 %1770  ;;  %v1652_v55 = vld [vmem:[#allocation3 + $0x70] sm:$0xff] }
 0x160   : > { %v4854_v30 = vpop.f32.mrb[54].mxu1  ;;  %3703 = vset.pattern.permute.xlu1 %v5659_v4  ;;  %3595 = vmatpush3.bf16.xpose.msk.msra.mxu0 %vm4741_vm3, %v3590_v0  ;;  %v3614_v3 = vpack.c.bf16 %v1653_v22, %v1652_v55  ;;  %v1633_v0 = vld [vmem:[#allocation2 + $0x58] sm:$0xff] }
 0x161   : > { %3717 = vset.pattern.permute.xlu0 %v5655_v37  ;;  %v4858_v18 = vpop.f32.mrb[55].mxu1  ;;  %2336 = vperm.xlu1 %3703, %v4760_v17  }
 0x162   : > { %2693 = vperm.xlu0 %3717, %v4842_v51   ;;  %3598 = vmatprep.subr.msk.bf16.mxu0 %vm4741_vm3, %v3596_v23 }
 0x163   : > { %v4928_v52 = vpop.permute.xlu1 %1775 }
 0x164   : > { %v4868_v43 = vpop.f32.mrb[56].mxu1 }
 0x165   : > { %v4870_v15 = vpop.f32.mrb[57].mxu1  ;;  %3705 = vset.pattern.permute.xlu1 %v5655_v37 }
 0x166   : > { %3720 = vset.pattern.permute.xlu0 %v5654_v39  ;;  %2668 = vperm.xlu1 %3705, %v4760_v17  }
 0x167   : > { %2522 = vperm.xlu0 %3720, %v4875_v10   ;;  %v4936_v24 = vpop.permute.xlu1 %1780 }
 0x168   : > { %v4878_v32 = vpop.f32.mrb[58].mxu1  ;;  %3601 = vmatpush3.bf16.xpose.msk.msra.mxu0 %vm4741_vm3, %v3596_v23  ;;  %v1636_v23 = vld [vmem:[#allocation2 + $0x70] sm:$0xff] }
 0x169   : > { %v4882_v41 = vpop.f32.mrb[59].mxu1  ;;  %3604 = vmatprep.subr.msk.bf16.mxu0 %vm4741_vm3, %v3602_v1 }
 0x16a   : > { %3706 = vset.pattern.permute.xlu1 %v5658_v40 }
 0x16b   : > { %3723 = vset.pattern.permute.xlu0 %v5659_v4  ;;  %2186 = vperm.xlu1 %3706, %v4774_v53   ;;  %v4946_v26 = vpop.permute.xlu1 %1785 }
 0x16c   : > { %v4893_v17 = vpop.f32.mrb[60].mxu1  ;;  %2371 = vperm.xlu0 %3723, %v4886_v34  }
 0x16d   : > { %v4896_v27 = vpop.f32.mrb[61].mxu1 }
 0x16f   : > { %3708 = vset.pattern.permute.xlu1 %v5654_v39  ;;  %v4954_v44 = vpop.permute.xlu1 %1790 }
 0x170   : > { %v4901_v46 = vpop.f32.mrb[62].mxu1  ;;  %3725 = vset.pattern.permute.xlu0 %v5655_v37  ;;  %2517 = vperm.xlu1 %3708, %v4774_v53   ;;  %v4917_v53 = vld [vmem:[#allocation4 + $0x50] sm:$0xff]  ;;  %5669 = vst [vmem:[#allocation12_spill] sm:$0xff] %v4954_v44 }
 0x171   : > { %v4905_v33 = vpop.f32.mrb[63].mxu1  ;;  %2703 = vperm.xlu0 %3725, %v4886_v34   ;;  %3607 = vmatpush3.bf16.xpose.msk.msra.mxu0 %vm4741_vm3, %v3602_v1 }
 0x172   : > { %3610 = vmatprep.subr.msk.bf16.mxu0 %vm4741_vm3, %v3608_v20 }
 0x173   : > { %v4966_v45 = vpop.permute.xlu1 %1795 }
 0x174   : > { %3710 = vset.pattern.permute.xlu1 %v5658_v40  ;;  %5670 = vst [vmem:[#allocation10_spill] sm:$0xff] %v4966_v45 }
 0x175   : > { %3728 = vset.pattern.permute.xlu0 %v5654_v39  ;;  %2181 = vperm.xlu1 %3710, %v4827_v35  }
 0x176   : > { %2532 = vperm.xlu0 %3728, %v4917_v53  }
 0x177   : > { %v4976_v57 = vpop.permute.xlu1 %1800 }
 0x178   : > { %5671 = vst [vmem:[#allocation13_spill] sm:$0xff] %v4976_v57 }
 0x179   : > { %3613 = vmatpush3.bf16.xpose.msk.msra.mxu0 %vm4741_vm3, %v3608_v20  ;;  %3711 = vset.pattern.permute.xlu1 %v5659_v4 }
 0x17a   : > { %3731 = vset.pattern.permute.xlu0 %v5659_v4  ;;  %3616 = vmatprep.subr.msk.bf16.mxu0 %vm4741_vm3, %v3614_v3 }
 0x17b   : > { %2346 = vperm.xlu1 %3711, %v4827_v35   ;;  %2381 = vperm.xlu0 %3731, %v4920_v58   ;;  %v4985_v16 = vpop.permute.xlu1 %1805 }
 0x17c   : > { %5672 = vst [vmem:[#allocation15_spill] sm:$0xff] %v4985_v16 }
 0x17f   : > { %3713 = vset.pattern.permute.xlu1 %v5655_v37  ;;  %3733 = vset.pattern.permute.xlu0 %v5655_v37  ;;  %v4993_v42 = vpop.permute.xlu1 %1810 }
 0x180   : > { %2678 = vperm.xlu1 %3713, %v4827_v35   ;;  %2713 = vperm.xlu0 %3733, %v4920_v58   ;;  %v1632_v35 = vld [vmem:[#allocation2 + $0x50] sm:$0xff]  ;;  %5673 = vst [vmem:[#allocation11_spill] sm:$0xff] %v4993_v42 }
 0x181   : > { %3619 = vmatpush3.bf16.xpose.msk.msra.mxu0 %vm4741_vm3, %v3614_v3 }
 0x183   : > { %v5001_v1 = vpop.permute.xlu1 %1815 }
 0x184   : > { %3714 = vset.pattern.permute.xlu1 %v5658_v40  ;;  %3734 = vset.pattern.permute.xlu0 %v5658_v40  ;;  %5674 = vst [vmem:[#allocation14_spill] sm:$0xff] %v5001_v1 }
 0x185   : > { %2196 = vperm.xlu1 %3714, %v4842_v51   ;;  %2211 = vperm.xlu0 %3734, %v4942_v56  }
 0x188   : > { %3501 = vmatmul.mubr.msk.f32.vlgmr.msra.gmra.mrb[32].mxu0 %vm1175_vm2, %v1623_v13 }
 0x189   : > { %3716 = vset.pattern.permute.xlu1 %v5654_v39  ;;  %3736 = vset.pattern.permute.xlu0 %v5654_v39 }
 0x18a   : > { %3503 = vmatprep.mubr.msk.f32.mxu0 %vm1175_vm2, %v1624_v50  ;;  %2527 = vperm.xlu1 %3716, %v4842_v51   ;;  %v1634_v51 = vld [vmem:[#allocation2 + $0x60] sm:$0xff] }
 0x18b   : > { %2542 = vperm.xlu0 %3736, %v4942_v56  }
 0x18c   : > { %3504 = vmatmul.mubr.msk.f32.gmra.mrb[34].mxu0 %vm1175_vm2, %v1625_v12 }
 0x18d   : > { %3506 = vmatprep.mubr.msk.f32.mxu0 %vm1175_vm2, %v1626_v49 }
 0x18e   : > { %3718 = vset.pattern.permute.xlu1 %v5658_v40 }
 0x18f   : > { %3739 = vset.pattern.permute.xlu0 %v5659_v4  ;;  %2191 = vperm.xlu1 %3718, %v4875_v10  }
 0x190   : > { %2391 = vperm.xlu0 %3739, %v4958_v36   ;;  %3507 = vmatmul.mubr.msk.f32.gmra.mrb[36].mxu0 %vm1175_vm2, %v1627_v54 }
 0x191   : > { %3509 = vmatprep.mubr.msk.f32.mxu0 %vm1175_vm2, %v1628_v14 }
 0x193   : > { %3719 = vset.pattern.permute.xlu1 %v5659_v4 }
 0x194   : > { %3741 = vset.pattern.permute.xlu0 %v5658_v40  ;;  %2356 = vperm.xlu1 %3719, %v4875_v10  }
 0x195   : > { %2221 = vperm.xlu0 %3741, %v4971_v48   ;;  %3510 = vmatmul.mubr.msk.f32.gmra.mrb[38].mxu0 %vm1175_vm2, %v1629_v21 }
 0x196   : > { %3512 = vmatprep.mubr.msk.f32.mxu0 %vm1175_vm2, %v1630_v7 }
 0x198   : > { %3721 = vset.pattern.permute.xlu1 %v5655_v37 }
 0x199   : > { %3743 = vset.pattern.permute.xlu0 %v5654_v39  ;;  %3513 = vmatmul.mubr.msk.f32.gmra.mrb[40].mxu0 %vm1175_vm2, %v1631_v5 }
 0x19a   : > { %2688 = vperm.xlu1 %3721, %v4875_v10   ;;  %2552 = vperm.xlu0 %3743, %v4971_v48   ;;  %v1637_v10 = vld [vmem:[#allocation2 + $0x78] sm:$0xff] }
 0x19b   : > { %3515 = vmatprep.mubr.msk.f32.mxu0 %vm1175_vm2, %v1632_v35 }
 0x19d   : > { %3516 = vmatmul.mubr.msk.f32.gmra.mrb[42].mxu0 %vm1175_vm2, %v1633_v0 }
 0x19e   : > { %3722 = vset.pattern.permute.xlu1 %v5658_v40  ;;  %3518 = vmatprep.mubr.msk.f32.mxu0 %vm1175_vm2, %v1634_v51 }
 0x19f   : > { %2206 = vperm.xlu1 %3722, %v4886_v34   ;;  %v4995_v31 = vpop.permute.xlu0 %2487  ;;  %v5007_v59 = vpop.permute.xlu1 %2156 }
 0x1a1   : > { %3519 = vmatmul.mubr.msk.f32.gmra.mrb[44].mxu0 %vm1175_vm2, %v1635_v61 }
 0x1a2   : > { %3521 = vmatprep.mubr.msk.f32.mxu0 %vm1175_vm2, %v1636_v23 }
 0x1a3   : > { %3724 = vset.pattern.permute.xlu1 %v5654_v39 }
 0x1a4   : > { %2537 = vperm.xlu1 %3724, %v4886_v34   ;;  %v5003_v25 = vpop.permute.xlu0 %2151  ;;  %v5014_v34 = vld [vmem:[%s5630_s8 + $0x1] ss:$0 sm:$0xff]  ;;  %v5020_v22 = vpop.permute.xlu1 %2321 }
 0x1a5   : > { %3522 = vmatmul.mubr.msk.f32.gmra.mrb[46].mxu0 %vm1175_vm2, %v1637_v10  ;;  %v1509_v55 = vadd.f32 %v5014_v34, %v4822_v9  ;;  %v1514_v13 = vadd.f32 %v4820_v63, %v5014_v34  ;;  %v1519_v9 = vadd.f32 %v5014_v34, %v4838_v28  ;;  %v1524_v63 = vadd.f32 %v4834_v47, %v5014_v34 }
 0x1a6   : > { %v1529_v54 = vadd.f32 %v5014_v34, %v4852_v6  ;;  %v1534_v14 = vadd.f32 %v4846_v29, %v5014_v34  ;;  %v1539_v47 = vadd.f32 %v5014_v34, %v4858_v18  ;;  %v1544_v29 = vadd.f32 %v4854_v30, %v5014_v34 }
 0x1a7   : > { %v1549_v18 = vadd.f32 %v5014_v34, %v4870_v15  ;;  %v1554_v30 = vadd.f32 %v4868_v43, %v5014_v34  ;;  %v1559_v15 = vadd.f32 %v5014_v34, %v4882_v41  ;;  %v1564_v35 = vadd.f32 %v4878_v32, %v5014_v34 }
 0x1a8   : > { %3726 = vset.pattern.permute.xlu1 %v5658_v40  ;;  %v1569_v43 = vadd.f32 %v5014_v34, %v4896_v27  ;;  %v1574_v41 = vadd.f32 %v4893_v17, %v5014_v34  ;;  %v1579_v32 = vadd.f32 %v5014_v34, %v4905_v33  ;;  %v1584_v10 = vadd.f32 %v4901_v46, %v5014_v34 }
 0x1a9   : > { %2201 = vperm.xlu1 %3726, %v4917_v53   ;;  %v5009_v20 = vpop.permute.xlu0 %2316  ;;  %v5028_v50 = vpop.permute.xlu1 %2653 }
 0x1ad   : > { %3727 = vset.pattern.permute.xlu1 %v5659_v4 }
 0x1ae   : > { %2366 = vperm.xlu1 %3727, %v4917_v53  }
 0x1af   : > { %v5022_v3 = vpop.permute.xlu0 %2648 }
 0x1b2   : > { %3729 = vset.pattern.permute.xlu1 %v5655_v37 }
 0x1b3   : > { %2698 = vperm.xlu1 %3729, %v4917_v53   ;;  %v5037_v53 = vpop.permute.xlu1 %2482 }
 0x1b4   : > { %v5030_v12 = vpop.permute.xlu0 %2331 }
 0x1b7   : > { %3730 = vset.pattern.permute.xlu1 %v5658_v40  ;;  %v5048_v28 = vpop.permute.xlu1 %2166 }
 0x1b8   : > { %2216 = vperm.xlu1 %3730, %v4920_v58   ;;  %1587 = vxpose.xlu0.b32.start [1/16] (narrow) %v1509_v55, 8 }
 0x1b9   : > { %v5039_v49 = vpop.permute.xlu0 %2663 }
 0x1bb   : > { %v5058_v6 = vpop.permute.xlu1 %2497 }
 0x1bc   : > { %3732 = vset.pattern.permute.xlu1 %v5654_v39  ;;  %1588 = vxpose.xlu0.b32.cont [2/16] (narrow) %v1514_v13, 8 }
 0x1bd   : > { %2547 = vperm.xlu1 %3732, %v4920_v58  }
 0x1be   : > { %v5050_v58 = vpop.permute.xlu0 %2341 }
 0x1c0   : > { %1589 = vxpose.xlu0.b32.cont [3/16] (narrow) %v1519_v9, 8 }
 0x1c1   : > { %3735 = vset.pattern.permute.xlu1 %v5659_v4 }
 0x1c2   : > { %2376 = vperm.xlu1 %3735, %v4942_v56  }
 0x1c3   : > { %v5060_v21 = vpop.permute.xlu0 %2673 }
 0x1c4   : > { %1590 = vxpose.xlu0.b32.cont [4/16] (narrow) %v1524_v63, 8 }
 0x1c6   : > { %3737 = vset.pattern.permute.xlu1 %v5655_v37 }
 0x1c7   : > { %2708 = vperm.xlu1 %3737, %v4942_v56   ;;  %v5066_v56 = vpop.permute.xlu1 %2161 }
 0x1c8   : > { %1591 = vxpose.xlu0.b32.cont [5/16] (narrow) %v1529_v54, 8 }
 0x1cb   : > { %3738 = vset.pattern.permute.xlu1 %v5658_v40  ;;  %v5068_v40 = vpop.permute.xlu0 %2502 }
 0x1cc   : > { %2226 = vperm.xlu1 %3738, %v4958_v36   ;;  %1592 = vxpose.xlu0.b32.cont [6/16] (narrow) %v1534_v14, 8 }
 0x1cf   : > { %v5076_v7 = vpop.permute.xlu0 %2351 }
 0x1d0   : > { %3740 = vset.pattern.permute.xlu1 %v5654_v39  ;;  %1593 = vxpose.xlu0.b32.cont [7/16] (narrow) %v1539_v47, 8  ;;  %v5074_v39 = vpop.permute.xlu1 %2326  ;;  %5675 = vst [vmem:[#allocation16_spill] sm:$0xff] %v5076_v7 }
 0x1d1   : > { %2557 = vperm.xlu1 %3740, %v4958_v36  }
 0x1d4   : > { %1594 = vxpose.xlu0.b32.cont [8/16] (narrow) %v1544_v29, 8  ;;  %v5084_v5 = vpop.permute.xlu1 %2492 }
 0x1d5   : > { %3742 = vset.pattern.permute.xlu1 %v5659_v4  ;;  %v5086_v4 = vpop.permute.xlu0 %2683 }
 0x1d6   : > { %2386 = vperm.xlu1 %3742, %v4971_v48   ;;  %5676 = vst [vmem:[#allocation17_spill] sm:$0xff] %v5086_v4 }
 0x1d8   : > { %1595 = vxpose.xlu0.b32.cont [9/16] (narrow) %v1549_v18, 8  ;;  %v5092_v0 = vpop.permute.xlu1 %2658 }
 0x1d9   : > { %v5094_v51 = vpop.permute.xlu0 %2512 }
 0x1da   : > { %3744 = vset.pattern.permute.xlu1 %v5655_v37  ;;  %5677 = vst [vmem:[#allocation18_spill] sm:$0xff] %v5094_v51 }
 0x1db   : > { %2718 = vperm.xlu1 %3744, %v4971_v48  }
 0x1dc   : > { %1596 = vxpose.xlu0.b32.cont [10/16] (narrow) %v1554_v30, 8  ;;  %v5098_v48 = vpop.permute.xlu1 %2176 }
 0x1dd   : > { %v5100_v61 = vpop.permute.xlu0 %2361 }
 0x1de   : > { %5678 = vst [vmem:[#allocation19_spill] sm:$0xff] %v5100_v61 }
 0x1e0   : > { %1597 = vxpose.xlu0.b32.cont [11/16] (narrow) %v1559_v15, 8  ;;  %v5104_v23 = vpop.permute.xlu1 %2507 }
 0x1e1   : > { %v5106_v27 = vpop.permute.xlu0 %2693 }
 0x1e2   : > { %5679 = vst [vmem:[#allocation20_spill] sm:$0xff] %v5106_v27 }
 0x1e4   : > { %1598 = vxpose.xlu0.b32.cont [12/16] (narrow) %v1564_v35, 8  ;;  %v5110_v55 = vpop.permute.xlu1 %2171 }
 0x1e6   : > { %v5112_v17 = vpop.permute.xlu0 %2522 }
 0x1e7   : > { %5680 = vst [vmem:[#allocation21_spill] sm:$0xff] %v5112_v17 }
 0x1e8   : > { %1599 = vxpose.xlu0.b32.cont [13/16] (narrow) %v1569_v43, 8  ;;  %v5114_v13 = vpop.permute.xlu1 %2336 }
 0x1eb   : > { %v5116_v9 = vpop.permute.xlu0 %2371 }
 0x1ec   : > { %1600 = vxpose.xlu0.b32.cont [14/16] (narrow) %v1574_v41, 8  ;;  %5681 = vst [vmem:[#allocation22_spill] sm:$0xff] %v5116_v9  ;;  %v5118_v63 = vpop.permute.xlu1 %2668 }
 0x1f0   : > { %1601 = vxpose.xlu0.b32.cont [15/16] (narrow) %v1579_v32, 8  ;;  %v5120_v33 = vpop.permute.xlu0 %2703  ;;  %v5122_v54 = vpop.permute.xlu1 %2186 }
 0x1f1   : > { %5682 = vst [vmem:[#allocation23_spill] sm:$0xff] %v5120_v33  ;;  %5683 = vst [vmem:[#allocation24_spill] sm:$0xff] %v5122_v54 }
 0x1f4   : > { %1602 = vxpose.xlu0.b32.end [16/16] (narrow) %v1584_v10, 8  ;;  %v5126_v47 = vpop.permute.xlu1 %2517 }
 0x1f5   : > { %v5124_v14 = vpop.permute.xlu0 %2532  ;;  %5685 = vst [vmem:[#allocation26_spill] sm:$0xff] %v5126_v47 }
 0x1f6   : > { %5684 = vst [vmem:[#allocation25_spill] sm:$0xff] %v5124_v14 }
 0x1f8   : > { %v5130_v34 = vpop.permute.xlu1 %2181 }
 0x1f9   : > { %5687 = vst [vmem:[#allocation28_spill] sm:$0xff] %v5130_v34 }
 0x1fa   : > { %v5128_v46 = vpop.permute.xlu0 %2381 }
 0x1fb   : > { %5686 = vst [vmem:[#allocation27_spill] sm:$0xff] %v5128_v46  ;;  %v1654_v46 = vlaneseq }
 0x1fc   : > { %v5134_v18 = vpop.permute.xlu1 %2346 }
 0x1fd   : > { %5689 = vst [vmem:[#allocation30_spill] sm:$0xff] %v5134_v18  ;;  %v5169_v33 = vand.u32 127, %v1654_v46 }
 0x1ff   : > { %v5132_v29 = vpop.permute.xlu0 %2713 }
 0x200   : > { %5688 = vst [vmem:[#allocation29_spill] sm:$0xff] %v5132_v29  ;;  %v5140_v15 = vpop.permute.xlu1 %2678 }
 0x201   : > { %5691 = vst [vmem:[#allocation32_spill] sm:$0xff] %v5140_v15  ;;  %v5705_v15 = vmov 0.0  }
 0x204   : > { %v5136_v30 = vpop.permute.xlu0 %2211  ;;  %v5144_v43 = vpop.permute.xlu1 %2196 }
 0x205   : > { %5690 = vst [vmem:[#allocation31_spill] sm:$0xff] %v5136_v30  ;;  %5693 = vst [vmem:[#allocation34_spill] sm:$0xff] %v5144_v43 }
 0x209   : > { %v5148_v32 = vpop.permute.xlu1 %2527 }
 0x20a   : > { %v5142_v35 = vpop.permute.xlu0 %2542  ;;  %5695 = vst [vmem:[#allocation36_spill] sm:$0xff] %v5148_v32 }
 0x20b   : > { %5692 = vst [vmem:[#allocation33_spill] sm:$0xff] %v5142_v35 }
 0x20e   : > { %v5152_v42 = vpop.permute.xlu1 %2191 }
 0x20f   : > { %v5146_v41 = vpop.permute.xlu0 %2391  ;;  %5697 = vst [vmem:[#allocation38_spill] sm:$0xff] %v5152_v42 }
 0x210   : > { %5694 = vst [vmem:[#allocation35_spill] sm:$0xff] %v5146_v41  ;;  %v5164_v41 = vshrl.u32 %v1654_v46, 7 }
 0x212   : > { %v1660_v9 = vadd.s32 40, %v5164_v41  ;;  %vm1690_vm5 = vcmp.gt.s32.totalorder %v5164_v41, %v5169_v33  ;;  %v1661_v46 = vadd.s32 48, %v5164_v41  ;;  %v5199_v42 = vadd.s32 64, %v5164_v41 }
 0x213   : > { %v5204_v32 = vadd.s32 88, %v5164_v41  ;;  %v5207_v61 = vadd.s32 80, %v5164_v41 }
 0x214   : > { %v5150_v10 = vpop.permute.xlu0 %2221  ;;  %vm1695_vm8 = vcmp.gt.s32.totalorder %v1660_v9, %v5169_v33  ;;  %vm1696_vm11 = vcmp.gt.s32.totalorder %v1661_v46, %v5169_v33  ;;  %vm1698_vm13 = vcmp.gt.s32.totalorder %v5199_v42, %v5169_v33 }
 0x215   : > { %5696 = vst [vmem:[#allocation37_spill] sm:$0xff] %v5150_v10  ;;  %v1656_v10 = vadd.s32 8, %v5164_v41  ;;  %v5226_v34 = vsel %vm1695_vm8, 1e+12, %v5705_v15  ;;  %vm1701_vm14 = vcmp.gt.s32.totalorder %v5204_v32, %v5169_v33  ;;  %vm1700_vm15 = vcmp.gt.s32.totalorder %v5207_v61, %v5169_v33 }
 0x217   : > { %vm1691_vm4 = vcmp.gt.s32.totalorder %v1656_v10, %v5169_v33  ;;  %v5645_v10 = vmov 0.0  }
 0x218   : > { %v1707_v57 = vsel %vm1691_vm4, 1e+12, %v5645_v10 }
 0x219   : > { %v5154_v29 = vpop.permute.xlu0 %2552 }
 0x21a   : > { %5698 = vst [vmem:[#allocation39_spill] sm:$0xff] %v5154_v29  ;;  %v1657_v29 = vadd.s32 16, %v5164_v41 }
 0x21c   : > { %vm1692_vm7 = vcmp.gt.s32.totalorder %v1657_v29, %v5169_v33 }
 0x21d   : > { %3745 = vset.pattern.permute.xlu0 %v5655_v37  ;;  %v5156_v37 = vpop.permute.xlu1 %2356 }
 0x21e   : > { %2723 = vperm.xlu0 %3745, %v4958_v36   ;;  %5699 = vst [vmem:[#allocation40_spill] sm:$0xff] %v5156_v37  ;;  %v5196_v37 = vadd.s32 72, %v5164_v41 }
 0x220   : > { %vm1699_vm12 = vcmp.gt.s32.totalorder %v5196_v37, %v5169_v33  ;;  %v5324_v37 = vsel %vm1700_vm15, 1e+12, %v5705_v15 }
 0x221   : > { %v5158_v36 = vpop.permute.xlu1 %2688 }
 0x222   : > { %5700 = vst [vmem:[#allocation41_spill] sm:$0xff] %v5158_v36  ;;  %v1706_v36 = vsel %vm1690_vm5, 1e+12, %v5645_v10 }
 0x225   : > { %v5160_v35 = vpop.permute.xlu1 %2206 }
 0x226   : > { %5701 = vst [vmem:[#allocation42_spill] sm:$0xff] %v5160_v35  ;;  %v1662_v35 = vadd.s32 56, %v5164_v41 }
 0x228   : > { %vm1697_vm10 = vcmp.gt.s32.totalorder %v1662_v35, %v5169_v33 }
 0x229   : > { %v5162_v14 = vpop.permute.xlu1 %2537 }
 0x22a   : > { %5702 = vst [vmem:[#allocation43_spill] sm:$0xff] %v5162_v14  ;;  %v1659_v14 = vadd.s32 32, %v5164_v41 }
 0x22c   : > { %vm1694_vm9 = vcmp.gt.s32.totalorder %v1659_v14, %v5169_v33 }
 0x22d   : > { %v5166_v1 = vpop.permute.xlu1 %2201 }
 0x22e   : > { %5703 = vst [vmem:[#allocation44_spill] sm:$0xff] %v5166_v1 }
 0x231   : > { %v5179_v1 = vpop.permute.xlu1 %2366 }
 0x232   : > { %5704 = vst [vmem:[#allocation45_spill] sm:$0xff] %v5179_v1  ;;  %v5191_v1 = vld [vmem:[%s394_s29] ss:$0 sm:$0xff]  ;;  %s3750_s29 = sshll.u32 %s3831_s20, 4  ;;  %s3751_s29 = int_to_ptr.vmem [resolvable:$false] %s3750_s29 }
 0x233   : > { %s3752_s16 = scalar_lea.vmem %s3751_s29, 16384  ;;  %p3753_p1 = scmp.lt.s32.totalorder %s5570_s15, %s3751_s29 }
 0x234   : > { %p3754_p2 = scmp.lt.s32.totalorder %s3752_s16, %s3746_s12 }
 0x235   : > { %v5220_v46 = vpop.permute.xlu1 %2698 }
 0x236   : > { %5706 = vst [vmem:[#allocation46_spill] sm:$0xff] %v5220_v46  ;;  %p3755_p3 = por %p3754_p2, %p3753_p1 }
 0x238   : > { %v1603_v30 = vpop.trf.xlu0  ;;  %p3756_p5 = pnand %p3755_p3, %p3749_p0 }
 0x239   : > { %1619 = vst [vmem:[#allocation5] sm:$0xf] %v1603_v30  ;;  %v1658_v30 = vadd.s32 24, %v5164_v41 }
 0x23b   : > { %vm1693_vm6 = vcmp.gt.s32.totalorder %v1658_v30, %v5169_v33 }
 0x23c   : > { %v1709_v51 = vsel %vm1693_vm6, 1e+12, %v5705_v15 }
 0x240   : > { %v5246_v9 = vld [vmem:[#allocation5] ss:$0 sm:$0xff]  ;;  %v5259_v46 = vld [vmem:[#allocation5 + $0x1] ss:$0 sm:$0xff]  ;;  %v5263_v4 = vld [vmem:[#allocation5 + $0x3] ss:$0 sm:$0xff] }
 0x25b   : > { %v3502_v17 = vpop.f32.mrb[32].mxu0 }
 0x25c   : > { %v1987_v10 = vadd.f32 %v3502_v17, %v4829_v8  ;;  %v1981_v27 = vpop.f32.mrb[33].mxu0  ;;  %v1708_v8 = vsel %vm1692_vm7, 1e+12, %v5705_v15  ;;  %v5218_v17 = vadd.s32 104, %v5164_v41 }
 0x25d   : > { %v1982_v43 = vadd.f32 %v1981_v27, %v4806_v19  ;;  %v5231_v19 = vsel %vm1694_vm9, 1e+12, %v5705_v15  ;;  %v5236_v27 = vsel %vm1697_vm10, 1e+12, %v5705_v15 }
 0x25e   : > { %v2068_v18 = vadd.f32 %v5191_v1, %v1987_v10  ;;  %v5240_v10 = vsel %vm1696_vm11, 1e+12, %v5705_v15  ;;  %vm1703_vm0 = vcmp.gt.s32.totalorder %v5218_v17, %v5169_v33 }
 0x25f   : > { %v2067_v29 = vadd.f32 %v5191_v1, %v1982_v43  ;;  %v3505_v30 = vpop.f32.mrb[34].mxu0  ;;  %5707 = vst [vmem:[#allocation47_spill] sm:$0xff] %v5240_v10  ;;  %v5257_v43 = vadd.s32 96, %v5164_v41  ;;  %v5261_v10 = vld [vmem:[#allocation5 + $0x2] ss:$0 sm:$0xff] }
 0x260   : > { %v2084_v14 = vsub.f32 %v2068_v18, %v1707_v57  ;;  %v1991_v35 = vpop.f32.mrb[35].mxu0  ;;  %v1997_v7 = vadd.f32 %v3505_v30, %v4866_v2  ;;  %v5277_v30 = vpop.permute.xlu1 %2216  ;;  %v5330_v42 = vsel %vm1703_vm0, 1e+12, %v5705_v15 }
 0x261   : > { %v2083_v47 = vsub.f32 %v2067_v29, %v1706_v36  ;;  %v1992_v57 = vadd.f32 %v1991_v35, %v4850_v38  ;;  %vm1702_vm1 = vcmp.gt.s32.totalorder %v5257_v43, %v5169_v33 }
 0x262   : > { %v2230_v18 = vadd.f32 %v5007_v59, %v2084_v14  ;;  %v2395_v54 = vadd.f32 %v5020_v22, %v2084_v14  ;;  %v2561_v16 = vadd.f32 %v4995_v31, %v2084_v14  ;;  %v2727_v44 = vadd.f32 %v5028_v50, %v2084_v14 }
 0x263   : > { %v2229_v45 = vadd.f32 %v5003_v25, %v2083_v47  ;;  %v2394_v36 = vadd.f32 %v5009_v20, %v2083_v47  ;;  %v2560_v2 = vadd.f32 %v5037_v53, %v2083_v47  ;;  %v2726_v38 = vadd.f32 %v5022_v3, %v2083_v47  ;;  %v3508_v29 = vpop.f32.mrb[36].mxu0 }
 0x264   : > { %v2250_v59 = vadd.f32 %v5246_v9, %v2230_v18  ;;  %v2415_v22 = vadd.f32 %v5259_v46, %v2395_v54  ;;  %v2581_v31 = vadd.f32 %v5261_v10, %v2561_v16  ;;  %v2747_v50 = vadd.f32 %v5263_v4, %v2727_v44  ;;  %v2001_v14 = vpop.f32.mrb[37].mxu0 }
 0x265   : > { %v2249_v25 = vadd.f32 %v5246_v9, %v2229_v45  ;;  %v2414_v20 = vadd.f32 %v5259_v46, %v2394_v36  ;;  %v2580_v53 = vadd.f32 %v5261_v10, %v2560_v2  ;;  %v2746_v3 = vadd.f32 %v5263_v4, %v2726_v38  ;;  %v5337_v36 = vpop.permute.xlu1 %2547 }
 0x266   : > { %2266 = vst [vmem:[%s5288_s27 + $0x8] sm:$0xff] %v2250_v59  ;;  %3067 = vst [vmem:[%s5288_s27 + $0x88] sm:$0xff] %v2415_v22  ;;  %v2070_v44 = vadd.f32 %v5191_v1, %v1997_v7  ;;  %v2069_v45 = vadd.f32 %v5191_v1, %v1992_v57  ;;  %v2007_v16 = vadd.f32 %v3508_v29, %v4898_v60  ;;  %v5306_v47 = vsel %vm1699_vm12, 1e+12, %v5705_v15 }
 0x267   : > { %3084 = vst [vmem:[%s5288_s27 + $0x108] sm:$0xff] %v2581_v31  ;;  %3101 = vst [vmem:[%s5288_s27 + $0x188] sm:$0xff] %v2747_v50  ;;  %v2002_v54 = vadd.f32 %v2001_v14, %v4880_v11  ;;  %v5312_v7 = vsel %vm1698_vm13, 1e+12, %v5705_v15  ;;  %v5318_v11 = vsel %vm1701_vm14, 1e+12, %v5705_v15 }
 0x268   : > { %2265 = vst [vmem:[%s5288_s27] sm:$0xff] %v2249_v25  ;;  %3066 = vst [vmem:[%s5288_s27 + $0x80] sm:$0xff] %v2414_v20  ;;  %v2086_v60 = vsub.f32 %v2070_v44, %v1709_v51  ;;  %v2085_v35 = vsub.f32 %v2069_v45, %v1708_v8  ;;  %v3511_v57 = vpop.f32.mrb[38].mxu0  ;;  %v2072_v18 = vadd.f32 %v5191_v1, %v2007_v16  ;;  %v5365_v20 = vsel %vm1702_vm1, 1e+12, %v5705_v15 }
 0x269   : > { %3083 = vst [vmem:[%s5288_s27 + $0x100] sm:$0xff] %v2580_v53  ;;  %3100 = vst [vmem:[%s5288_s27 + $0x180] sm:$0xff] %v2746_v3  ;;  %v2071_v32 = vadd.f32 %v5191_v1, %v2002_v54  ;;  %v2017_v51 = vadd.f32 %v3511_v57, %v4928_v52  ;;  %v2011_v8 = vpop.f32.mrb[39].mxu0  ;;  %v5368_v53 = vadd.s32 120, %v5164_v41  ;;  %v5378_v45 = vpop.permute.xlu1 %2376 }
 0x26a   : > { %v2232_v61 = vadd.f32 %v5048_v28, %v2086_v60  ;;  %v2397_v2 = vadd.f32 %v5030_v12, %v2086_v60  ;;  %v2563_v17 = vadd.f32 %v5058_v6, %v2086_v60  ;;  %v2729_v38 = vadd.f32 %v5039_v49, %v2086_v60 }
 0x26b   : > { %v2231_v29 = vadd.f32 %v5066_v56, %v2085_v35  ;;  %v2396_v52 = vadd.f32 %v5074_v39, %v2085_v35  ;;  %v2562_v59 = vadd.f32 %v5084_v5, %v2085_v35  ;;  %v2728_v22 = vadd.f32 %v5092_v0, %v2085_v35 }
 0x26c   : > { %v2252_v28 = vadd.f32 %v5246_v9, %v2232_v61  ;;  %v2417_v12 = vadd.f32 %v5259_v46, %v2397_v2  ;;  %v2583_v6 = vadd.f32 %v5261_v10, %v2563_v17  ;;  %v2749_v49 = vadd.f32 %v5263_v4, %v2729_v38  ;;  %v3514_v31 = vpop.f32.mrb[40].mxu0  ;;  %v5708_v17 = vld [vmem:[#allocation10_spill] sm:$0xff] }
 0x26d   : > { %v2251_v56 = vadd.f32 %v5246_v9, %v2231_v29  ;;  %v2416_v39 = vadd.f32 %v5259_v46, %v2396_v52  ;;  %v2582_v5 = vadd.f32 %v5261_v10, %v2562_v59  ;;  %v2748_v0 = vadd.f32 %v5263_v4, %v2728_v22  ;;  %v2021_v50 = vpop.f32.mrb[41].mxu0  ;;  %v5709_v29 = vld [vmem:[#allocation12_spill] sm:$0xff]  ;;  %v5710_v59 = vld [vmem:[#allocation15_spill] sm:$0xff] }
 0x26e   : > { %2268 = vst [vmem:[%s5288_s27 + $0x18] sm:$0xff] %v2252_v28  ;;  %3069 = vst [vmem:[%s5288_s27 + $0x98] sm:$0xff] %v2417_v12  ;;  %v2088_v14 = vsub.f32 %v2072_v18, %v5226_v34  ;;  %v2087_v25 = vsub.f32 %v2071_v32, %v5231_v19  ;;  %v2074_v3 = vadd.f32 %v5191_v1, %v2017_v51  ;;  %v5414_v12 = vpop.permute.xlu1 %2708 }
 0x26f   : > { %3086 = vst [vmem:[%s5288_s27 + $0x118] sm:$0xff] %v2583_v6  ;;  %3103 = vst [vmem:[%s5288_s27 + $0x198] sm:$0xff] %v2749_v49  ;;  %v2012_v44 = vadd.f32 %v2011_v8, %v4913_v62  ;;  %v2027_v34 = vadd.f32 %v3514_v31, %v4946_v26  ;;  %v2022_v19 = vadd.f32 %v2021_v50, %v4936_v24  ;;  %v5711_v6 = vld [vmem:[#allocation24_spill] sm:$0xff] }
 0x270   : > { %2267 = vst [vmem:[%s5288_s27 + $0x10] sm:$0xff] %v2251_v56  ;;  %3068 = vst [vmem:[%s5288_s27 + $0x90] sm:$0xff] %v2416_v39  ;;  %v2234_v43 = vadd.f32 %v5098_v48, %v2088_v14  ;;  %v2399_v16 = vadd.f32 %v5050_v58, %v2088_v14  ;;  %v2565_v54 = vadd.f32 %v5104_v23, %v2088_v14  ;;  %v3517_v35 = vpop.f32.mrb[42].mxu0  ;;  %v5712_v31 = vld [vmem:[#allocation16_spill] sm:$0xff]  ;;  %v5713_v39 = vld [vmem:[#allocation26_spill] sm:$0xff] }
 0x271   : > { %3085 = vst [vmem:[%s5288_s27 + $0x110] sm:$0xff] %v2582_v5  ;;  %3102 = vst [vmem:[%s5288_s27 + $0x190] sm:$0xff] %v2748_v0  ;;  %v2731_v60 = vadd.f32 %v5060_v21, %v2088_v14  ;;  %v2233_v62 = vadd.f32 %v5110_v55, %v2087_v25  ;;  %v2398_v26 = vadd.f32 %v5114_v13, %v2087_v25  ;;  %v2031_v48 = vpop.f32.mrb[43].mxu0  ;;  %v5714_v0 = vld [vmem:[#allocation17_spill] sm:$0xff]  ;;  %v5715_v14 = vld [vmem:[#allocation47_spill] sm:$0xff] }
 0x272   : > { %v2564_v24 = vadd.f32 %v5068_v40, %v2087_v25  ;;  %v2730_v57 = vadd.f32 %v5118_v63, %v2087_v25  ;;  %v2254_v58 = vadd.f32 %v5246_v9, %v2234_v43  ;;  %v2419_v23 = vadd.f32 %v5259_v46, %v2399_v16 }
 0x273   : > { %v2585_v21 = vadd.f32 %v5261_v10, %v2565_v54  ;;  %v2751_v18 = vadd.f32 %v5263_v4, %v2731_v60  ;;  %v2253_v55 = vadd.f32 %v5246_v9, %v2233_v62  ;;  %v2418_v13 = vadd.f32 %v5259_v46, %v2398_v26  ;;  %v5716_v60 = vld [vmem:[#allocation28_spill] sm:$0xff]  ;;  %v5717_v62 = vld [vmem:[#allocation30_spill] sm:$0xff] }
 0x274   : > { %v2584_v40 = vadd.f32 %v5261_v10, %v2564_v24  ;;  %v2750_v63 = vadd.f32 %v5263_v4, %v2730_v57  ;;  %2270 = vst [vmem:[%s5288_s27 + $0x28] sm:$0xff] %v2254_v58  ;;  %3071 = vst [vmem:[%s5288_s27 + $0xa8] sm:$0xff] %v2419_v23  ;;  %v2090_v32 = vsub.f32 %v2074_v3, %v5236_v27  ;;  %v3520_v2 = vpop.f32.mrb[44].mxu0  ;;  %v5412_v27 = vadd.s32 112, %v5164_v41  ;;  %v5718_v24 = vld [vmem:[#allocation18_spill] sm:$0xff]  ;;  %v5719_v57 = vld [vmem:[#allocation32_spill] sm:$0xff] }
 0x275   : > { %3088 = vst [vmem:[%s5288_s27 + $0x128] sm:$0xff] %v2585_v21  ;;  %3105 = vst [vmem:[%s5288_s27 + $0x1a8] sm:$0xff] %v2751_v18  ;;  %v2073_v51 = vadd.f32 %v5191_v1, %v2012_v44  ;;  %v2076_v8 = vadd.f32 %v5191_v1, %v2027_v34  ;;  %v2075_v61 = vadd.f32 %v5191_v1, %v2022_v19  ;;  %v2041_v28 = vpop.f32.mrb[45].mxu0  ;;  %v5720_v58 = vld [vmem:[#allocation34_spill] sm:$0xff]  ;;  %v5721_v21 = vld [vmem:[#allocation19_spill] sm:$0xff] }
 0x276   : > { %2269 = vst [vmem:[%s5288_s27 + $0x20] sm:$0xff] %v2253_v55  ;;  %3070 = vst [vmem:[%s5288_s27 + $0xa0] sm:$0xff] %v2418_v13  ;;  %v2037_v38 = vadd.f32 %v3517_v35, %v5708_v17  ;;  %v2032_v52 = vadd.f32 %v2031_v48, %v5709_v29  ;;  %v2047_v22 = vadd.f32 %v3520_v2, %v5710_v59  ;;  %v5722_v55 = vld [vmem:[#allocation36_spill] sm:$0xff]  ;;  %v5446_v2 = vpop.permute.xlu1 %2226 }
 0x277   : > { %3087 = vst [vmem:[%s5288_s27 + $0x120] sm:$0xff] %v2584_v40  ;;  %3104 = vst [vmem:[%s5288_s27 + $0x1a0] sm:$0xff] %v2750_v63  ;;  %v2236_v49 = vadd.f32 %v5711_v6, %v2090_v32  ;;  %v2401_v56 = vadd.f32 %v5712_v31, %v2090_v32  ;;  %v2567_v5 = vadd.f32 %v5713_v39, %v2090_v32  ;;  %v5723_v40 = vld [vmem:[#allocation20_spill] sm:$0xff]  ;;  %v5724_v6 = vld [vmem:[#allocation38_spill] sm:$0xff] }
 0x278   : > { %v2733_v50 = vadd.f32 %v5714_v0, %v2090_v32  ;;  %v2089_v25 = vsub.f32 %v2073_v51, %v5715_v14  ;;  %v2092_v3 = vsub.f32 %v2076_v8, %v5306_v47  ;;  %v2091_v41 = vsub.f32 %v2075_v61, %v5312_v7  ;;  %v3523_v54 = vpop.f32.mrb[46].mxu0  ;;  %v5725_v31 = vld [vmem:[#allocation40_spill] sm:$0xff]  ;;  %v5726_v39 = vld [vmem:[#allocation21_spill] sm:$0xff] }
 0x279   : > { %v2078_v44 = vadd.f32 %v5191_v1, %v2037_v38  ;;  %v2256_v34 = vadd.f32 %v5246_v9, %v2236_v49  ;;  %v2421_v19 = vadd.f32 %v5259_v46, %v2401_v56  ;;  %v2587_v43 = vadd.f32 %v5261_v10, %v2567_v5  ;;  %v5432_v7 = vpop.f32.mrb[47].mxu0  ;;  %v5727_v0 = vld [vmem:[#allocation41_spill] sm:$0xff] }
 0x27a   : > { %v2753_v16 = vadd.f32 %v5263_v4, %v2733_v50  ;;  %v2235_v35 = vadd.f32 %v5716_v60, %v2089_v25  ;;  %v2400_v26 = vadd.f32 %v5717_v62, %v2089_v25  ;;  %v2566_v47 = vadd.f32 %v5718_v24, %v2089_v25 }
 0x27b   : > { %v2732_v48 = vadd.f32 %v5719_v57, %v2089_v25  ;;  %2272 = vst [vmem:[%s5288_s27 + $0x38] sm:$0xff] %v2256_v34  ;;  %3073 = vst [vmem:[%s5288_s27 + $0xb8] sm:$0xff] %v2421_v19  ;;  %v2238_v23 = vadd.f32 %v5720_v58, %v2092_v3  ;;  %v2403_v18 = vadd.f32 %v5721_v21, %v2092_v3  ;;  %v5728_v34 = vld [vmem:[#allocation13_spill] sm:$0xff] }
 0x27c   : > { %3090 = vst [vmem:[%s5288_s27 + $0x138] sm:$0xff] %v2587_v43  ;;  %3107 = vst [vmem:[%s5288_s27 + $0x1b8] sm:$0xff] %v2753_v16  ;;  %v2569_v13 = vadd.f32 %v5722_v55, %v2092_v3  ;;  %v2735_v63 = vadd.f32 %v5723_v40, %v2092_v3  ;;  %v2255_v32 = vadd.f32 %v5246_v9, %v2235_v35  ;;  %v5729_v35 = vld [vmem:[#allocation42_spill] sm:$0xff]  ;;  %v5734_v40 = vld [vmem:[#allocation44_spill] sm:$0xff] }
 0x27d   : > { %v2420_v51 = vadd.f32 %v5259_v46, %v2400_v26  ;;  %v2586_v8 = vadd.f32 %v5261_v10, %v2566_v47  ;;  %v2752_v61 = vadd.f32 %v5263_v4, %v2732_v48  ;;  %v2258_v17 = vadd.f32 %v5246_v9, %v2238_v23  ;;  %v5730_v26 = vld [vmem:[#allocation22_spill] sm:$0xff]  ;;  %v5731_v47 = vld [vmem:[#allocation43_spill] sm:$0xff]  ;;  %v2558_v23 = vpop.permute.xlu1 %2557 }
 0x27e   : > { %v2423_v38 = vadd.f32 %v5259_v46, %v2403_v18  ;;  %v2589_v29 = vadd.f32 %v5261_v10, %v2569_v13  ;;  %v2755_v59 = vadd.f32 %v5263_v4, %v2735_v63  ;;  %vm1705_vm2 = vcmp.gt.s32.totalorder %v5368_v53, %v5169_v33  ;;  %2271 = vst [vmem:[%s5288_s27 + $0x30] sm:$0xff] %v2255_v32  ;;  %v5733_v48 = vld [vmem:[#allocation14_spill] sm:$0xff]  ;;  %v5735_v32 = vld [vmem:[#allocation45_spill] sm:$0xff] }
 0x27f   : > { %3072 = vst [vmem:[%s5288_s27 + $0xb0] sm:$0xff] %v2420_v51  ;;  %3089 = vst [vmem:[%s5288_s27 + $0x130] sm:$0xff] %v2586_v8  ;;  %v2237_v49 = vadd.f32 %v5724_v6, %v2091_v41  ;;  %v2402_v56 = vadd.f32 %v5725_v31, %v2091_v41  ;;  %v2568_v5 = vadd.f32 %v5726_v39, %v2091_v41  ;;  %v5736_v51 = vld [vmem:[#allocation25_spill] sm:$0xff] }
 0x280   : > { %3106 = vst [vmem:[%s5288_s27 + $0x1b0] sm:$0xff] %v2752_v61  ;;  %v2734_v50 = vadd.f32 %v5727_v0, %v2091_v41  ;;  %vm1704_vm3 = vcmp.gt.s32.totalorder %v5412_v27, %v5169_v33  ;;  %2274 = vst [vmem:[%s5288_s27 + $0x48] sm:$0xff] %v2258_v17  ;;  %v2094_v14 = vsub.f32 %v2078_v44, %v5318_v11  ;;  %v5732_v44 = vld [vmem:[#allocation23_spill] sm:$0xff] }
 0x281   : > { %3075 = vst [vmem:[%s5288_s27 + $0xc8] sm:$0xff] %v2423_v38  ;;  %3092 = vst [vmem:[%s5288_s27 + $0x148] sm:$0xff] %v2589_v29  ;;  %v2077_v25 = vadd.f32 %v5191_v1, %v2032_v52  ;;  %v2080_v3 = vadd.f32 %v5191_v1, %v2047_v22  ;;  %v2042_v19 = vadd.f32 %v2041_v28, %v5728_v34  ;;  %v5738_v17 = vld [vmem:[#allocation27_spill] sm:$0xff] }
 0x282   : > { %3109 = vst [vmem:[%s5288_s27 + $0x1c8] sm:$0xff] %v2755_v59  ;;  %v2257_v41 = vadd.f32 %v5246_v9, %v2237_v49  ;;  %v2422_v43 = vadd.f32 %v5259_v46, %v2402_v56  ;;  %v2588_v16 = vadd.f32 %v5261_v10, %v2568_v5  ;;  %v2754_v60 = vadd.f32 %v5263_v4, %v2734_v50  ;;  %v5739_v59 = vld [vmem:[#allocation29_spill] sm:$0xff] }
 0x283   : > { %v2240_v62 = vadd.f32 %v5729_v35, %v2094_v14  ;;  %v2405_v24 = vadd.f32 %v5730_v26, %v2094_v14  ;;  %v2571_v11 = vadd.f32 %v5731_v47, %v2094_v14  ;;  %v2737_v52 = vadd.f32 %v5732_v44, %v2094_v14  ;;  %v5743_v47 = vld [vmem:[#allocation35_spill] sm:$0xff] }
 0x284   : > { %2273 = vst [vmem:[%s5288_s27 + $0x40] sm:$0xff] %v2257_v41  ;;  %3074 = vst [vmem:[%s5288_s27 + $0xc0] sm:$0xff] %v2422_v43  ;;  %v2093_v22 = vsub.f32 %v2077_v25, %v5324_v37  ;;  %v2096_v28 = vsub.f32 %v2080_v3, %v5330_v42  ;;  %v2079_v57 = vadd.f32 %v5191_v1, %v2042_v19  ;;  %v5737_v42 = vld [vmem:[#allocation46_spill] sm:$0xff]  ;;  %v1721_v14 = vsel %vm1705_vm2, 1e+12, %v5705_v15  ;;  %v5740_v3 = vld [vmem:[#allocation11_spill] sm:$0xff]  ;;  %v2387_v19 = vpop.permute.xlu1 %2386 }
 0x285   : > { %3091 = vst [vmem:[%s5288_s27 + $0x140] sm:$0xff] %v2588_v16  ;;  %3108 = vst [vmem:[%s5288_s27 + $0x1c0] sm:$0xff] %v2754_v60  ;;  %v2057_v58 = vadd.f32 %v3523_v54, %v5733_v48  ;;  %v2260_v21 = vadd.f32 %v5246_v9, %v2240_v62  ;;  %v2425_v18 = vadd.f32 %v5259_v46, %v2405_v24  ;;  %v5741_v41 = vld [vmem:[#allocation31_spill] sm:$0xff]  ;;  %v5742_v16 = vld [vmem:[#allocation33_spill] sm:$0xff] }
 0x286   : > { %v2591_v55 = vadd.f32 %v5261_v10, %v2571_v11  ;;  %v2757_v13 = vadd.f32 %v5263_v4, %v2737_v52  ;;  %v2239_v63 = vadd.f32 %v5734_v40, %v2093_v22  ;;  %v2404_v37 = vadd.f32 %v5735_v32, %v2093_v22  ;;  %v5745_v48 = vld [vmem:[#allocation39_spill] sm:$0xff] }
 0x287   : > { %v2570_v8 = vadd.f32 %v5736_v51, %v2093_v22  ;;  %v2736_v61 = vadd.f32 %v5737_v42, %v2093_v22  ;;  %2276 = vst [vmem:[%s5288_s27 + $0x58] sm:$0xff] %v2260_v21  ;;  %3077 = vst [vmem:[%s5288_s27 + $0xd8] sm:$0xff] %v2425_v18  ;;  %v2242_v54 = vadd.f32 %v5277_v30, %v2096_v28  ;;  %v5744_v22 = vld [vmem:[#allocation37_spill] sm:$0xff] }
 0x288   : > { %3094 = vst [vmem:[%s5288_s27 + $0x158] sm:$0xff] %v2591_v55  ;;  %3111 = vst [vmem:[%s5288_s27 + $0x1d8] sm:$0xff] %v2757_v13  ;;  %v2407_v38 = vadd.f32 %v5738_v17, %v2096_v28  ;;  %v2573_v29 = vadd.f32 %v5337_v36, %v2096_v28  ;;  %v2739_v6 = vadd.f32 %v5739_v59, %v2096_v28 }
 0x289   : > { %v2259_v49 = vadd.f32 %v5246_v9, %v2239_v63  ;;  %v2424_v31 = vadd.f32 %v5259_v46, %v2404_v37  ;;  %v2590_v56 = vadd.f32 %v5261_v10, %v2570_v8  ;;  %v2756_v39 = vadd.f32 %v5263_v4, %v2736_v61 }
 0x28a   : > { %v2262_v5 = vadd.f32 %v5246_v9, %v2242_v54  ;;  %v2427_v30 = vadd.f32 %v5259_v46, %v2407_v38  ;;  %v2593_v36 = vadd.f32 %v5261_v10, %v2573_v29  ;;  %v2759_v0 = vadd.f32 %v5263_v4, %v2739_v6 }
 0x28b   : > { %2275 = vst [vmem:[%s5288_s27 + $0x50] sm:$0xff] %v2259_v49  ;;  %3076 = vst [vmem:[%s5288_s27 + $0xd0] sm:$0xff] %v2424_v31  ;;  %v2095_v50 = vsub.f32 %v2079_v57, %v5365_v20  ;;  %v2082_v25 = vadd.f32 %v5191_v1, %v2057_v58  ;;  %v2052_v34 = vadd.f32 %v5432_v7, %v5740_v3  ;;  %v1720_v20 = vsel %vm1704_vm3, 1e+12, %v5705_v15 }
 0x28c   : > { %3093 = vst [vmem:[%s5288_s27 + $0x150] sm:$0xff] %v2590_v56  ;;  %3110 = vst [vmem:[%s5288_s27 + $0x1d0] sm:$0xff] %v2756_v39 }
 0x28d   : > { %2278 = vst [vmem:[%s5288_s27 + $0x68] sm:$0xff] %v2262_v5  ;;  %3079 = vst [vmem:[%s5288_s27 + $0xe8] sm:$0xff] %v2427_v30  ;;  %v2241_v53 = vadd.f32 %v5741_v41, %v2095_v50  ;;  %v2406_v43 = vadd.f32 %v5378_v45, %v2095_v50  ;;  %v2572_v7 = vadd.f32 %v5742_v16, %v2095_v50 }
 0x28e   : > { %3096 = vst [vmem:[%s5288_s27 + $0x168] sm:$0xff] %v2593_v36  ;;  %3113 = vst [vmem:[%s5288_s27 + $0x1e8] sm:$0xff] %v2759_v0  ;;  %v2738_v60 = vadd.f32 %v5414_v12, %v2095_v50  ;;  %v2098_v35 = vsub.f32 %v2082_v25, %v1721_v14  ;;  %v2081_v62 = vadd.f32 %v5191_v1, %v2052_v34  ;;  %v2719_v1 = vpop.permute.xlu1 %2718 }
 0x28f   : > { %v2261_v26 = vadd.f32 %v5246_v9, %v2241_v53  ;;  %v2426_v33 = vadd.f32 %v5259_v46, %v2406_v43  ;;  %v2592_v15 = vadd.f32 %v5261_v10, %v2572_v7 }
 0x290   : > { %v2758_v27 = vadd.f32 %v5263_v4, %v2738_v60  ;;  %v2244_v24 = vadd.f32 %v5446_v2, %v2098_v35  ;;  %v2409_v45 = vadd.f32 %v5743_v47, %v2098_v35  ;;  %v2575_v11 = vadd.f32 %v2558_v23, %v2098_v35 }
 0x291   : > { %v2097_v12 = vsub.f32 %v2081_v62, %v1720_v20  ;;  %2277 = vst [vmem:[%s5288_s27 + $0x60] sm:$0xff] %v2261_v26  ;;  %3078 = vst [vmem:[%s5288_s27 + $0xe0] sm:$0xff] %v2426_v33 }
 0x292   : > { %3095 = vst [vmem:[%s5288_s27 + $0x160] sm:$0xff] %v2592_v15  ;;  %3112 = vst [vmem:[%s5288_s27 + $0x1e0] sm:$0xff] %v2758_v27  ;;  %v2264_v44 = vadd.f32 %v5246_v9, %v2244_v24  ;;  %v2429_v52 = vadd.f32 %v5259_v46, %v2409_v45  ;;  %v2595_v2 = vadd.f32 %v5261_v10, %v2575_v11 }
 0x293   : > { %v2243_v28 = vadd.f32 %v5744_v22, %v2097_v12  ;;  %v2408_v57 = vadd.f32 %v2387_v19, %v2097_v12  ;;  %v2574_v58 = vadd.f32 %v5745_v48, %v2097_v12  ;;  %v2740_v23 = vadd.f32 %v2719_v1, %v2097_v12 }
 0x294   : > { %2280 = vst [vmem:[%s5288_s27 + $0x78] sm:$0xff] %v2264_v44  ;;  %3081 = vst [vmem:[%s5288_s27 + $0xf8] sm:$0xff] %v2429_v52 }
 0x295   : > { %3098 = vst [vmem:[%s5288_s27 + $0x178] sm:$0xff] %v2595_v2  ;;  %v2263_v21 = vadd.f32 %v5246_v9, %v2243_v28  ;;  %v2428_v18 = vadd.f32 %v5259_v46, %v2408_v57  ;;  %v2594_v55 = vadd.f32 %v5261_v10, %v2574_v58  ;;  %v2760_v13 = vadd.f32 %v5263_v4, %v2740_v23 }
 0x297   : > { %2279 = vst [vmem:[%s5288_s27 + $0x70] sm:$0xff] %v2263_v21  ;;  %3080 = vst [vmem:[%s5288_s27 + $0xf0] sm:$0xff] %v2428_v18 }
 0x298   : > { %3097 = vst [vmem:[%s5288_s27 + $0x170] sm:$0xff] %v2594_v55  ;;  %3114 = vst [vmem:[%s5288_s27 + $0x1f0] sm:$0xff] %v2760_v13 }
 0x29d   : > { %v2724_v40 = vpop.permute.xlu0 %2723 }
 0x29e   : > { %v2741_v63 = vadd.f32 %v2724_v40, %v2098_v35 }
 0x2a0   : > { %v2761_v46 = vadd.f32 %v5263_v4, %v2741_v63 }
 0x2a2   : > { %3115 = vst [vmem:[%s5288_s27 + $0x1f8] sm:$0xff] %v2761_v46 }
 0x2a3   : > { %3759 = shalt.err (!%p3756_p5)
}
 0x2a4   : > { %s3760_s28 = scalar_lea.hbm %s5568_s25, 8192  ;;  %s3764_s23 = scalar_lea.hbm %s5631_s9, 16384 }
 0x2a5   : > { %p3761_p6 = scmp.ne.s32.totalorder %s5568_s25, %s3760_s28  ;;  %p3765_p10 = scmp.lt.u32.totalorder %s5568_s25, %s5631_s9 }
 0x2a6   : > { %p3766_p11 = scmp.lt.u32.totalorder %s3764_s23, %s3760_s28  ;;  %p3768_p13 = scmp.lt.u32.totalorder %s3760_s28, %s5568_s25 }
 0x2a7   : > { %p3762_p7 = pnand %p3761_p6, %p3924_p4 }
 0x2a8   : > { %p3767_p12 = por %p3766_p11, %p3765_p10 }
 0x2a9   : > { %p3763_p9 = pneg %p3762_p7 }
 0x2aa   : > { %p3769_p0 = por %p3768_p13, %p3767_p12 }
 0x2ac   : > { %p3770_p1 = pnand %p3769_p0, %p3763_p9 }
 0x2ae   : > { %3773 = shalt.err (!%p3770_p1)
}
 0x2af   : > { %s3832_s12 = smov 128   ;;  %s3833_s29 = smov 8  }
 0x2b0   : > { %3620 = dma.vmem_to_hbm [thread:$0]  (%p3924_p4), %s5570_s15, 8192, %s5568_s25, %s5576_s26, %s3832_s12, %s3832_s12, %s3833_s29  }
 0x2b1 PF: > { %p3626_p2 = scmp.ge.s32.totalorder %s3824_s14, 2  ;;  %s2810_s16 = sand.u32 1, %s3804_s30  }
 0x2b2   : > { %s2811_s28 = scalar_lea.sflag [#allocation8], %s2810_s16 }
 0x2b3   : > { %p3623_p3 = pnand %p3626_p2, %p3931_p8 }
 0x2b5   : > { %3799 = dma.done.wait (!%p3623_p3), %s2811_s28, 8192  }
 0x2b6   : > { %3801 = vsyncadd (!%p3623_p3), %s2811_s28, 4294959104  ;;  %s22_s14 = sadd.s32 1, %s3824_s14   ;;  %s5746_s30 = smov %s3808_s10 }
 0x2b7   : > { %p19_p5 = scmp.ge.s32.totalorder %s22_s14, 4   ;;  %s5747_s10 = smov %s3812_s11 }
 0x2b8   : > { %s5748_s11 = smov %s3937_s22  ;;  %s5749_s12 = smov %s3820_s13 }
 0x2b9   : > { %s5750_s13 = smov %s5752_s17  ;;  %21 = sbr.rel (!%p19_p5) target bundleno = 4 (0x4), region = 114 }
 0x2c0   :  { %2816 = vsyncpa [#allocation8], 1 }
 0x2c1   :  { %2818 = vsyncpa [#allocation8 + $0x1], 1 }

</bundles_post_ra>
